<compile_context>
chip_gen: v7x
topology: tpu7x:2x2x1
jax: 0.10.0
libtpu: 0.0.40
codegen_flags: <defaults>
</compile_context>

<pallas_src>
import functools

import jax
import jax.numpy as jnp
from jax import lax
from jax.experimental import pallas as pl
from jax.experimental.pallas import tpu as pltpu

BN_EPS = 1e-5
_TB = 256                        # batch tile for the gridded (large-batch) path
_VMEM_LIMIT = 8 * 1024 * 1024    # resident weights ~1 MiB (bf16) + tiles


# ----------------------------- Pallas kernel --------------------------------

def _fused_model_kernel(x_ref,
                        tw1_ref, tb1_ref, tsw_ref, tsb_ref, tw2_ref, tb2_ref,
                        hw1_ref, hb1_ref, hsw_ref, hsb_ref,
                        wout_ref, bout_ref,
                        o_ref,
                        *, n_trunk_stages, n_head_stages):
    f32 = jnp.float32
    bf16 = jnp.bfloat16

    def dense(v, w, b):
        # bf16 x bf16 MXU matmul with f32 accumulation; f32 bias added after.
        return jnp.dot(v.astype(bf16), w, preferred_element_type=f32) + b

    # ---- combined trunk: w1 -> BN -> ReLU -> residual stages -> w2 ----------
    y = jnp.maximum(dense(x_ref[...], tw1_ref[...], tb1_ref[...]), 0.0)
    for s in range(n_trunk_stages):                       # unrolled (static)
        h = jnp.maximum(dense(y, tsw_ref[2 * s], tsb_ref[2 * s]), 0.0)
        y = y + jnp.maximum(dense(h, tsw_ref[2 * s + 1], tsb_ref[2 * s + 1]), 0.0)
    y = dense(y, tw2_ref[...], tb2_ref[...])               # final trunk linear

    # ---- three heads fused along N: activation is (B, 3*L) ------------------
    yh = jnp.maximum(dense(y, hw1_ref[...], hb1_ref[...]), 0.0)
    for s in range(n_head_stages):                         # block-diag stages
        hh = jnp.maximum(dense(yh, hsw_ref[2 * s], hsb_ref[2 * s]), 0.0)
        yh = yh + jnp.maximum(
            dense(hh, hsw_ref[2 * s + 1], hsb_ref[2 * s + 1]), 0.0)

    # Final projections occupy disjoint column ranges of wout (concat == sum).
    o_ref[...] = dense(yh, wout_ref[...], bout_ref[...]).astype(o_ref.dtype)


# --------------------------- parameter init (torch-like) --------------------

def _init_linear(key, fan_in, fan_out):
    # PyTorch nn.Linear default init: U(-1/sqrt(fan_in), 1/sqrt(fan_in)).
    # Stored as (in, out) so the kernel computes x @ W + b directly.
    kw, kb = jax.random.split(key)
    bound = 1.0 / (fan_in ** 0.5)
    w = jax.random.uniform(kw, (fan_in, fan_out), jnp.float32, -bound, bound)
    b = jax.random.uniform(kb, (fan_out,), jnp.float32, -bound, bound)
    return {"w": w, "b": b}


def _init_bn(n):
    # eval-mode BatchNorm1d, default buffers.
    return {"gamma": jnp.ones((n,), jnp.float32),
            "beta": jnp.zeros((n,), jnp.float32),
            "mean": jnp.zeros((n,), jnp.float32),
            "var": jnp.ones((n,), jnp.float32)}


def init_linear_model(key, input_size, linear_size, output_size, num_stage):
    keys = jax.random.split(key, 2 + 2 * num_stage)
    params = {"w1": _init_linear(keys[0], input_size, linear_size),
              "bn1": _init_bn(linear_size),
              "stages": [],
              "w2": _init_linear(keys[1], linear_size, output_size)}
    for s in range(num_stage):
        params["stages"].append({
            "w1": _init_linear(keys[2 + 2 * s], linear_size, linear_size),
            "bn1": _init_bn(linear_size),
            "w2": _init_linear(keys[3 + 2 * s], linear_size, linear_size),
            "bn2": _init_bn(linear_size)})
    return params


def init_linear_model_complete(key, *, linear_size, num_stage_comb,
                               num_stage_heads, num_stage_heads_pose,
                               input_size, intermediate_size, n_joints):
    k0, k1, k2, k3 = jax.random.split(key, 4)
    # default output_info: pose (n_joints*6), trans (3), flength (1)
    return {
        "linear_combined": init_linear_model(
            k0, input_size, linear_size, intermediate_size, num_stage_comb),
        "pose_head": init_linear_model(
            k1, intermediate_size, linear_size, n_joints * 6,
            num_stage_heads_pose),
        "trans_head": init_linear_model(
            k2, intermediate_size, linear_size, 3, num_stage_heads),
        "flength_head": init_linear_model(
            k3, intermediate_size, linear_size, 1, num_stage_heads),
    }


# --------------------------- BN folding & packing ----------------------------

def _fold(lin, bn=None):
    # Fold eval-mode BN into the preceding Linear (numerically identical).
    # NOTE: when loading trained checkpoints, re-fold from the real buffers.
    w, b = lin["w"], lin["b"]
    if bn is not None:
        scale = bn["gamma"] / jnp.sqrt(bn["var"] + BN_EPS)
        shift = bn["beta"] - bn["mean"] * scale
        w = w * scale[None, :]
        b = b * scale + shift
    return w, b


def _pack_linear_model(lm):
    w1, b1 = _fold(lm["w1"], lm["bn1"])
    sw, sb = [], []
    for s in lm["stages"]:
        for wkey, bnkey in (("w1", "bn1"), ("w2", "bn2")):
            w, b = _fold(s[wkey], s[bnkey])
            sw.append(w)
            sb.append(b)
    w2, b2 = _fold(lm["w2"], None)
    sw = jnp.stack(sw)                      # (2S, L, L)
    sb = jnp.stack(sb)                      # (2S, L)  -- flat, lane-dense
    return {"w1": w1, "b1": b1.reshape(1, -1), "sw": sw, "sb": sb,
            "w2": w2, "b2": b2.reshape(1, -1), "n_stages": len(lm["stages"])}


def pack_model(params, n_joints):
    trunk = _pack_linear_model(params["linear_combined"])
    heads = [_pack_linear_model(params[k])
             for k in ("pose_head", "trans_head", "flength_head")]
    head_out_sizes = [n_joints * 6, 3, 1]
    n_heads = len(heads)

    n_head_stages = heads[0]["n_stages"]
    assert all(h["n_stages"] == n_head_stages for h in heads), \
        "fused-head packing assumes equal num_stage for all heads"
    # TODO(synk): heads with differing num_stage would need per-head packing.

    L = heads[0]["w1"].shape[1]
    LH = n_heads * L                                        # fused head width

    # First head layer: column-stack -> one (interm, 3L) matmul.
    hw1 = jnp.concatenate([h["w1"] for h in heads], axis=1)        # (I, 3L)
    hb1 = jnp.concatenate([h["b1"] for h in heads], axis=1)        # (1, 3L)

    # Residual-stage weights: block-diagonal -> one (3L, 3L) matmul per layer.
    hsw = jnp.zeros((2 * n_head_stages, LH, LH), jnp.float32)
    hsb = jnp.zeros((2 * n_head_stages, LH), jnp.float32)
    for hd, h in enumerate(heads):
        r0, r1 = hd * L, (hd + 1) * L
        hsw = hsw.at[:, r0:r1, r0:r1].set(h["sw"])
        hsb = hsb.at[:, r0:r1].set(h["sb"])

    # Final projections: each head's w2 goes in its own row-range and its own
    # disjoint column-range of one (3L, out_pad) matrix (lane-dense output).
    total_out = sum(head_out_sizes)
    out_pad = pl.cdiv(total_out, 128) * 128
    wout = jnp.zeros((LH, out_pad), jnp.float32)
    bout = jnp.zeros((1, out_pad), jnp.float32)
    slices, off = [], 0
    for hd, (h, n) in enumerate(zip(heads, head_out_sizes)):
        wout = wout.at[hd * L:(hd + 1) * L, off:off + n].set(h["w2"])
        bout = bout.at[0, off:off + n].set(h["b2"][0])
        slices.append((off, n))
        off += n
    # Concat-as-sum requires disjoint, in-range column slices.
    assert off <= out_pad
    assert all(slices[i][0] + slices[i][1] <= slices[i + 1][0]
               for i in range(len(slices) - 1))

    bf16 = jnp.bfloat16
    arrays = {"tw1": trunk["w1"].astype(bf16), "tb1": trunk["b1"],
              "tsw": trunk["sw"].astype(bf16), "tsb": trunk["sb"],
              "tw2": trunk["w2"].astype(bf16), "tb2": trunk["b2"],
              "hw1": hw1.astype(bf16), "hb1": hb1,
              "hsw": hsw.astype(bf16), "hsb": hsb,
              "wout": wout.astype(bf16), "bout": bout}
    config = {"out_pad": out_pad,
              "n_trunk_stages": trunk["n_stages"],
              "n_head_stages": n_head_stages,
              "slices": tuple(slices),
              "n_joints": n_joints}
    return arrays, config


# ------------------------------ forward pass ---------------------------------

def make_forward(config):
    kernel = functools.partial(
        _fused_model_kernel,
        n_trunk_stages=config["n_trunk_stages"],
        n_head_stages=config["n_head_stages"])
    out_pad = config["out_pad"]

    def fwd(arrays, x):
        B, K = x.shape
        weights = (arrays["tw1"], arrays["tb1"], arrays["tsw"], arrays["tsb"],
                   arrays["tw2"], arrays["tb2"],
                   arrays["hw1"], arrays["hb1"], arrays["hsw"], arrays["hsb"],
                   arrays["wout"], arrays["bout"])

        if B <= _TB:
            # Small batch: single whole-array invocation, no grid loop.
            B_pad = max(16, pl.cdiv(B, 16) * 16)   # bf16 sublane packing = 16
            x_pad = jnp.pad(x.astype(jnp.float32), ((0, B_pad - B), (0, 0)))
            out = pl.pallas_call(
                kernel,
                out_shape=jax.ShapeDtypeStruct((B_pad, out_pad), jnp.float32),
                compiler_params=pltpu.CompilerParams(
                    vmem_limit_bytes=_VMEM_LIMIT),
            )(x_pad, *weights)
        else:
            # Large batch: 1-D "parallel" batch grid.  Weights use constant
            # index_maps (stay VMEM-resident), x/out tiles are pipelined, and
            # on v7x the parallel axis is sharded across both TensorCores.
            B_pad = pl.cdiv(B, _TB) * _TB
            x_pad = jnp.pad(x.astype(jnp.float32), ((0, B_pad - B), (0, 0)))

            def const_spec(a):
                nd = a.ndim
                return pl.BlockSpec(a.shape, lambda i, _nd=nd: (0,) * _nd)

            out = pl.pallas_call(
                kernel,
                out_shape=jax.ShapeDtypeStruct((B_pad, out_pad), jnp.float32),
                grid=(B_pad // _TB,),
                in_specs=[pl.BlockSpec((_TB, K), lambda i: (i, 0))]
                         + [const_spec(w) for w in weights],
                out_specs=pl.BlockSpec((_TB, out_pad), lambda i: (i, 0)),
                compiler_params=pltpu.CompilerParams(
                    dimension_semantics=("parallel",),
                    vmem_limit_bytes=_VMEM_LIMIT),
            )(x_pad, *weights)

        out = out[:B]
        (p_off, p_n), (t_off, t_n), (f_off, f_n) = config["slices"]
        pose = out[:, p_off:p_off + p_n].reshape(B, config["n_joints"], 6)
        trans = out[:, t_off:t_off + t_n]
        flength = out[:, f_off:f_off + f_n]
        # structure_pose_net == 'default' -> normflow_z is None
        return {"pose": pose, "trans": trans, "flength": flength,
                "normflow_z": None}

    return jax.jit(fwd)


# ---------------------- pure-JAX references (sanity checks) ------------------

def _dense_ref(v, w, b, *, bf16_mirror):
    if bf16_mirror:
        # Mirror the kernel's numerics: bf16 dot inputs, f32 accumulation,
        # f32 bias added after.
        v = v.astype(jnp.bfloat16).astype(jnp.float32)
        w = w.astype(jnp.bfloat16).astype(jnp.float32)
    return jnp.dot(v, w, precision=lax.Precision.HIGHEST) + b


def _linear_model_ref(lm, x, *, bf16_mirror):
    def apply(v, lin, bn=None, relu=False):
        w, b = _fold(lin, bn)
        y = _dense_ref(v, w, b, bf16_mirror=bf16_mirror)
        return jnp.maximum(y, 0.0) if relu else y

    y = apply(x, lm["w1"], lm["bn1"], relu=True)
    for s in lm["stages"]:
        h = apply(y, s["w1"], s["bn1"], relu=True)
        y = y + apply(h, s["w2"], s["bn2"], relu=True)
    return apply(y, lm["w2"], None, relu=False)


def _complete_ref(params, x, n_joints, *, bf16_mirror=False):
    y = _linear_model_ref(params["linear_combined"], x, bf16_mirror=bf16_mirror)
    pose = _linear_model_ref(params["pose_head"], y, bf16_mirror=bf16_mirror)
    return {"pose": pose.reshape(-1, n_joints, 6),
            "trans": _linear_model_ref(params["trans_head"], y,
                                       bf16_mirror=bf16_mirror),
            "flength": _linear_model_ref(params["flength_head"], y,
                                         bf16_mirror=bf16_mirror)}


# ------------------------------------ main -----------------------------------

if __name__ == "__main__":
    INPUT_SIZE = 16 * 2          # default keypoint input (16*2)
    LINEAR_SIZE = 128
    INTERMEDIATE_SIZE = 128
    N_JOINTS = 25
    NUM_STAGE_COMB = 2
    NUM_STAGE_HEADS = 1
    NUM_STAGE_HEADS_POSE = 1

    root = jax.random.PRNGKey(0)
    k_param, k_x1, k_x2 = jax.random.split(root, 3)

    params = init_linear_model_complete(
        k_param,
        linear_size=LINEAR_SIZE,
        num_stage_comb=NUM_STAGE_COMB,
        num_stage_heads=NUM_STAGE_HEADS,
        num_stage_heads_pose=NUM_STAGE_HEADS_POSE,
        input_size=INPUT_SIZE,
        intermediate_size=INTERMEDIATE_SIZE,
        n_joints=N_JOINTS)

    arrays, config = pack_model(params, N_JOINTS)
    forward = make_forward(config)

    # ---- small batch: grid-less single-invocation path -----------------------
    B = 2
    x = jax.random.normal(k_x1, (B, INPUT_SIZE), jnp.float32)
    results = forward(arrays, x)
    jax.block_until_ready(results["pose"])

    assert results["pose"].shape == (B, N_JOINTS, 6)
    assert results["trans"].shape == (B, 3)
    assert results["flength"].shape == (B, 1)
    assert results["normflow_z"] is None

    ref_mirror = _complete_ref(params, x, N_JOINTS, bf16_mirror=True)
    ref_f32 = _complete_ref(params, x, N_JOINTS, bf16_mirror=False)
    for name in ("pose", "trans", "flength"):
        # Packing/fusion correctness (bit-level numerics mirrored).
        assert bool(jnp.allclose(results[name], ref_mirror[name],
                                 rtol=2e-3, atol=2e-3)), name
        # bf16 weights stay close to the fp32 eval-mode reference.
        assert bool(jnp.allclose(results[name], ref_f32[name],
                                 rtol=1e-1, atol=1e-1)), name

    # ---- larger batch: exercises the 1-D 'parallel' batch-grid path ----------
    B2 = 520
    x2 = jax.random.normal(k_x2, (B2, INPUT_SIZE), jnp.float32)
    results2 = forward(arrays, x2)
    jax.block_until_ready(results2["pose"])
    assert results2["pose"].shape == (B2, N_JOINTS, 6)
    ref2 = _complete_ref(params, x2, N_JOINTS, bf16_mirror=True)
    for name in ("pose", "trans", "flength"):
        assert bool(jnp.allclose(results2[name], ref2[name],
                                 rtol=2e-3, atol=2e-3)), name

    # TODO(synk): training-mode Dropout / batch-stat BatchNorm are stochastic /
    # batch-dependent; eval-mode semantics are implemented instead.
    print("KERNEL_OK")
</pallas_src>

<mosaic_0001>
module attributes {stable_mosaic.version = 11 : i64} {
  func.func @_fused_model_kernel(%arg0: memref<16x32xf32, #tpu.memory_space<vmem>>, %arg1: memref<32x128xbf16, #tpu.memory_space<vmem>>, %arg2: memref<1x128xf32, #tpu.memory_space<vmem>>, %arg3: memref<4x128x128xbf16, #tpu.memory_space<vmem>>, %arg4: memref<4x128xf32, #tpu.memory_space<vmem>>, %arg5: memref<128x128xbf16, #tpu.memory_space<vmem>>, %arg6: memref<1x128xf32, #tpu.memory_space<vmem>>, %arg7: memref<128x384xbf16, #tpu.memory_space<vmem>>, %arg8: memref<1x384xf32, #tpu.memory_space<vmem>>, %arg9: memref<2x384x384xbf16, #tpu.memory_space<vmem>>, %arg10: memref<2x384xf32, #tpu.memory_space<vmem>>, %arg11: memref<384x256xbf16, #tpu.memory_space<vmem>>, %arg12: memref<1x256xf32, #tpu.memory_space<vmem>>, %arg13: memref<16x256xf32, #tpu.memory_space<vmem>>) attributes {dimension_semantics = [], scalar_prefetch = 0 : i64, scratch_operands = 0 : i64, tpu.core_type = #tpu.core_type<tc>} {
    %c0 = arith.constant 0 : index
    %c0_0 = arith.constant 0 : index
    %0 = vector.load %arg0[%c0, %c0_0] : memref<16x32xf32, #tpu.memory_space<vmem>>, vector<16x32xf32>
    %c0_1 = arith.constant 0 : index
    %c0_2 = arith.constant 0 : index
    %1 = vector.load %arg1[%c0_1, %c0_2] : memref<32x128xbf16, #tpu.memory_space<vmem>>, vector<32x128xbf16>
    %c0_3 = arith.constant 0 : index
    %c0_4 = arith.constant 0 : index
    %2 = vector.load %arg2[%c0_3, %c0_4] : memref<1x128xf32, #tpu.memory_space<vmem>>, vector<1x128xf32>
    %3 = arith.truncf %0 : vector<16x32xf32> to vector<16x32xbf16>
    %cst = arith.constant dense<0.000000e+00> : vector<16x128xf32>
    %4 = tpu.matmul %3, %1, %cst {dimension_numbers = #tpu.dot_dimension_numbers<[1], [0], [0], [1], [0, 0, 1, 1], [], []>} : vector<16x32xbf16>, vector<32x128xbf16>, vector<16x128xf32> -> vector<16x128xf32>
    %5 = vector.broadcast %2 : vector<1x128xf32> to vector<16x128xf32>
    %6 = arith.addf %4, %5 : vector<16x128xf32>
    %cst_5 = arith.constant 0.000000e+00 : f32
    %7 = vector.broadcast %cst_5 : f32 to vector<16x128xf32>
    %8 = arith.maximumf %6, %7 : vector<16x128xf32>
    %c0_6 = arith.constant 0 : index
    %c0_7 = arith.constant 0 : index
    %c0_8 = arith.constant 0 : index
    %9 = vector.load %arg3[%c0_6, %c0_7, %c0_8] : memref<4x128x128xbf16, #tpu.memory_space<vmem>>, vector<1x128x128xbf16>
    %10 = vector.shape_cast %9 : vector<1x128x128xbf16> to vector<128x128xbf16>
    %c0_9 = arith.constant 0 : index
    %c0_10 = arith.constant 0 : index
    %11 = vector.load %arg4[%c0_9, %c0_10] : memref<4x128xf32, #tpu.memory_space<vmem>>, vector<1x128xf32>
    %12 = vector.shape_cast %11 : vector<1x128xf32> to vector<128xf32>
    %13 = arith.truncf %8 : vector<16x128xf32> to vector<16x128xbf16>
    %cst_11 = arith.constant dense<0.000000e+00> : vector<16x128xf32>
    %14 = tpu.matmul %13, %10, %cst_11 {dimension_numbers = #tpu.dot_dimension_numbers<[1], [0], [0], [1], [0, 0, 1, 1], [], []>} : vector<16x128xbf16>, vector<128x128xbf16>, vector<16x128xf32> -> vector<16x128xf32>
    %15 = vector.shape_cast %12 : vector<128xf32> to vector<1x128xf32>
    %16 = vector.broadcast %15 : vector<1x128xf32> to vector<16x128xf32>
    %17 = arith.addf %14, %16 : vector<16x128xf32>
    %cst_12 = arith.constant 0.000000e+00 : f32
    %18 = vector.broadcast %cst_12 : f32 to vector<16x128xf32>
    %19 = arith.maximumf %17, %18 : vector<16x128xf32>
    %c1 = arith.constant 1 : index
    %c0_13 = arith.constant 0 : index
    %c0_14 = arith.constant 0 : index
    %20 = vector.load %arg3[%c1, %c0_13, %c0_14] : memref<4x128x128xbf16, #tpu.memory_space<vmem>>, vector<1x128x128xbf16>
    %21 = vector.shape_cast %20 : vector<1x128x128xbf16> to vector<128x128xbf16>
    %c1_15 = arith.constant 1 : index
    %c0_16 = arith.constant 0 : index
    %22 = vector.load %arg4[%c1_15, %c0_16] : memref<4x128xf32, #tpu.memory_space<vmem>>, vector<1x128xf32>
    %23 = vector.shape_cast %22 : vector<1x128xf32> to vector<128xf32>
    %24 = arith.truncf %19 : vector<16x128xf32> to vector<16x128xbf16>
    %cst_17 = arith.constant dense<0.000000e+00> : vector<16x128xf32>
    %25 = tpu.matmul %24, %21, %cst_17 {dimension_numbers = #tpu.dot_dimension_numbers<[1], [0], [0], [1], [0, 0, 1, 1], [], []>} : vector<16x128xbf16>, vector<128x128xbf16>, vector<16x128xf32> -> vector<16x128xf32>
    %26 = vector.shape_cast %23 : vector<128xf32> to vector<1x128xf32>
    %27 = vector.broadcast %26 : vector<1x128xf32> to vector<16x128xf32>
    %28 = arith.addf %25, %27 : vector<16x128xf32>
    %cst_18 = arith.constant 0.000000e+00 : f32
    %29 = vector.broadcast %cst_18 : f32 to vector<16x128xf32>
    %30 = arith.maximumf %28, %29 : vector<16x128xf32>
    %31 = arith.addf %8, %30 : vector<16x128xf32>
    %c2 = arith.constant 2 : index
    %c0_19 = arith.constant 0 : index
    %c0_20 = arith.constant 0 : index
    %32 = vector.load %arg3[%c2, %c0_19, %c0_20] : memref<4x128x128xbf16, #tpu.memory_space<vmem>>, vector<1x128x128xbf16>
    %33 = vector.shape_cast %32 : vector<1x128x128xbf16> to vector<128x128xbf16>
    %c2_21 = arith.constant 2 : index
    %c0_22 = arith.constant 0 : index
    %34 = vector.load %arg4[%c2_21, %c0_22] : memref<4x128xf32, #tpu.memory_space<vmem>>, vector<1x128xf32>
    %35 = vector.shape_cast %34 : vector<1x128xf32> to vector<128xf32>
    %36 = arith.truncf %31 : vector<16x128xf32> to vector<16x128xbf16>
    %cst_23 = arith.constant dense<0.000000e+00> : vector<16x128xf32>
    %37 = tpu.matmul %36, %33, %cst_23 {dimension_numbers = #tpu.dot_dimension_numbers<[1], [0], [0], [1], [0, 0, 1, 1], [], []>} : vector<16x128xbf16>, vector<128x128xbf16>, vector<16x128xf32> -> vector<16x128xf32>
    %38 = vector.shape_cast %35 : vector<128xf32> to vector<1x128xf32>
    %39 = vector.broadcast %38 : vector<1x128xf32> to vector<16x128xf32>
    %40 = arith.addf %37, %39 : vector<16x128xf32>
    %cst_24 = arith.constant 0.000000e+00 : f32
    %41 = vector.broadcast %cst_24 : f32 to vector<16x128xf32>
    %42 = arith.maximumf %40, %41 : vector<16x128xf32>
    %c3 = arith.constant 3 : index
    %c0_25 = arith.constant 0 : index
    %c0_26 = arith.constant 0 : index
    %43 = vector.load %arg3[%c3, %c0_25, %c0_26] : memref<4x128x128xbf16, #tpu.memory_space<vmem>>, vector<1x128x128xbf16>
    %44 = vector.shape_cast %43 : vector<1x128x128xbf16> to vector<128x128xbf16>
    %c3_27 = arith.constant 3 : index
    %c0_28 = arith.constant 0 : index
    %45 = vector.load %arg4[%c3_27, %c0_28] : memref<4x128xf32, #tpu.memory_space<vmem>>, vector<1x128xf32>
    %46 = vector.shape_cast %45 : vector<1x128xf32> to vector<128xf32>
    %47 = arith.truncf %42 : vector<16x128xf32> to vector<16x128xbf16>
    %cst_29 = arith.constant dense<0.000000e+00> : vector<16x128xf32>
    %48 = tpu.matmul %47, %44, %cst_29 {dimension_numbers = #tpu.dot_dimension_numbers<[1], [0], [0], [1], [0, 0, 1, 1], [], []>} : vector<16x128xbf16>, vector<128x128xbf16>, vector<16x128xf32> -> vector<16x128xf32>
    %49 = vector.shape_cast %46 : vector<128xf32> to vector<1x128xf32>
    %50 = vector.broadcast %49 : vector<1x128xf32> to vector<16x128xf32>
    %51 = arith.addf %48, %50 : vector<16x128xf32>
    %cst_30 = arith.constant 0.000000e+00 : f32
    %52 = vector.broadcast %cst_30 : f32 to vector<16x128xf32>
    %53 = arith.maximumf %51, %52 : vector<16x128xf32>
    %54 = arith.addf %31, %53 : vector<16x128xf32>
    %c0_31 = arith.constant 0 : index
    %c0_32 = arith.constant 0 : index
    %55 = vector.load %arg5[%c0_31, %c0_32] : memref<128x128xbf16, #tpu.memory_space<vmem>>, vector<128x128xbf16>
    %c0_33 = arith.constant 0 : index
    %c0_34 = arith.constant 0 : index
    %56 = vector.load %arg6[%c0_33, %c0_34] : memref<1x128xf32, #tpu.memory_space<vmem>>, vector<1x128xf32>
    %57 = arith.truncf %54 : vector<16x128xf32> to vector<16x128xbf16>
    %cst_35 = arith.constant dense<0.000000e+00> : vector<16x128xf32>
    %58 = tpu.matmul %57, %55, %cst_35 {dimension_numbers = #tpu.dot_dimension_numbers<[1], [0], [0], [1], [0, 0, 1, 1], [], []>} : vector<16x128xbf16>, vector<128x128xbf16>, vector<16x128xf32> -> vector<16x128xf32>
    %59 = vector.broadcast %56 : vector<1x128xf32> to vector<16x128xf32>
    %60 = arith.addf %58, %59 : vector<16x128xf32>
    %c0_36 = arith.constant 0 : index
    %c0_37 = arith.constant 0 : index
    %61 = vector.load %arg7[%c0_36, %c0_37] : memref<128x384xbf16, #tpu.memory_space<vmem>>, vector<128x384xbf16>
    %c0_38 = arith.constant 0 : index
    %c0_39 = arith.constant 0 : index
    %62 = vector.load %arg8[%c0_38, %c0_39] : memref<1x384xf32, #tpu.memory_space<vmem>>, vector<1x384xf32>
    %63 = arith.truncf %60 : vector<16x128xf32> to vector<16x128xbf16>
    %cst_40 = arith.constant dense<0.000000e+00> : vector<16x384xf32>
    %64 = tpu.matmul %63, %61, %cst_40 {dimension_numbers = #tpu.dot_dimension_numbers<[1], [0], [0], [1], [0, 0, 1, 1], [], []>} : vector<16x128xbf16>, vector<128x384xbf16>, vector<16x384xf32> -> vector<16x384xf32>
    %65 = vector.broadcast %62 : vector<1x384xf32> to vector<16x384xf32>
    %66 = arith.addf %64, %65 : vector<16x384xf32>
    %cst_41 = arith.constant 0.000000e+00 : f32
    %67 = vector.broadcast %cst_41 : f32 to vector<16x384xf32>
    %68 = arith.maximumf %66, %67 : vector<16x384xf32>
    %c0_42 = arith.constant 0 : index
    %c0_43 = arith.constant 0 : index
    %c0_44 = arith.constant 0 : index
    %69 = vector.load %arg9[%c0_42, %c0_43, %c0_44] : memref<2x384x384xbf16, #tpu.memory_space<vmem>>, vector<1x384x384xbf16>
    %70 = vector.shape_cast %69 : vector<1x384x384xbf16> to vector<384x384xbf16>
    %c0_45 = arith.constant 0 : index
    %c0_46 = arith.constant 0 : index
    %71 = vector.load %arg10[%c0_45, %c0_46] : memref<2x384xf32, #tpu.memory_space<vmem>>, vector<1x384xf32>
    %72 = vector.shape_cast %71 : vector<1x384xf32> to vector<384xf32>
    %73 = arith.truncf %68 : vector<16x384xf32> to vector<16x384xbf16>
    %cst_47 = arith.constant dense<0.000000e+00> : vector<16x384xf32>
    %74 = tpu.matmul %73, %70, %cst_47 {dimension_numbers = #tpu.dot_dimension_numbers<[1], [0], [0], [1], [0, 0, 1, 1], [], []>} : vector<16x384xbf16>, vector<384x384xbf16>, vector<16x384xf32> -> vector<16x384xf32>
    %75 = vector.shape_cast %72 : vector<384xf32> to vector<1x384xf32>
    %76 = vector.broadcast %75 : vector<1x384xf32> to vector<16x384xf32>
    %77 = arith.addf %74, %76 : vector<16x384xf32>
    %cst_48 = arith.constant 0.000000e+00 : f32
    %78 = vector.broadcast %cst_48 : f32 to vector<16x384xf32>
    %79 = arith.maximumf %77, %78 : vector<16x384xf32>
    %c1_49 = arith.constant 1 : index
    %c0_50 = arith.constant 0 : index
    %c0_51 = arith.constant 0 : index
    %80 = vector.load %arg9[%c1_49, %c0_50, %c0_51] : memref<2x384x384xbf16, #tpu.memory_space<vmem>>, vector<1x384x384xbf16>
    %81 = vector.shape_cast %80 : vector<1x384x384xbf16> to vector<384x384xbf16>
    %c1_52 = arith.constant 1 : index
    %c0_53 = arith.constant 0 : index
    %82 = vector.load %arg10[%c1_52, %c0_53] : memref<2x384xf32, #tpu.memory_space<vmem>>, vector<1x384xf32>
    %83 = vector.shape_cast %82 : vector<1x384xf32> to vector<384xf32>
    %84 = arith.truncf %79 : vector<16x384xf32> to vector<16x384xbf16>
    %cst_54 = arith.constant dense<0.000000e+00> : vector<16x384xf32>
    %85 = tpu.matmul %84, %81, %cst_54 {dimension_numbers = #tpu.dot_dimension_numbers<[1], [0], [0], [1], [0, 0, 1, 1], [], []>} : vector<16x384xbf16>, vector<384x384xbf16>, vector<16x384xf32> -> vector<16x384xf32>
    %86 = vector.shape_cast %83 : vector<384xf32> to vector<1x384xf32>
    %87 = vector.broadcast %86 : vector<1x384xf32> to vector<16x384xf32>
    %88 = arith.addf %85, %87 : vector<16x384xf32>
    %cst_55 = arith.constant 0.000000e+00 : f32
    %89 = vector.broadcast %cst_55 : f32 to vector<16x384xf32>
    %90 = arith.maximumf %88, %89 : vector<16x384xf32>
    %91 = arith.addf %68, %90 : vector<16x384xf32>
    %c0_56 = arith.constant 0 : index
    %c0_57 = arith.constant 0 : index
    %92 = vector.load %arg11[%c0_56, %c0_57] : memref<384x256xbf16, #tpu.memory_space<vmem>>, vector<384x256xbf16>
    %c0_58 = arith.constant 0 : index
    %c0_59 = arith.constant 0 : index
    %93 = vector.load %arg12[%c0_58, %c0_59] : memref<1x256xf32, #tpu.memory_space<vmem>>, vector<1x256xf32>
    %94 = arith.truncf %91 : vector<16x384xf32> to vector<16x384xbf16>
    %cst_60 = arith.constant dense<0.000000e+00> : vector<16x256xf32>
    %95 = tpu.matmul %94, %92, %cst_60 {dimension_numbers = #tpu.dot_dimension_numbers<[1], [0], [0], [1], [0, 0, 1, 1], [], []>} : vector<16x384xbf16>, vector<384x256xbf16>, vector<16x256xf32> -> vector<16x256xf32>
    %96 = vector.broadcast %93 : vector<1x256xf32> to vector<16x256xf32>
    %97 = arith.addf %95, %96 : vector<16x256xf32>
    %c0_61 = arith.constant 0 : index
    %c0_62 = arith.constant 0 : index
    %98 = vector.load %arg13[%c0_61, %c0_62] : memref<16x256xf32, #tpu.memory_space<vmem>>, vector<16x256xf32>
    tpu.vector_store %arg13[%c0_61, %c0_62], %97 {strides = array<i32>} : memref<16x256xf32, #tpu.memory_space<vmem>>, vector<16x256xf32>,
    return
  }
}

</mosaic_0001>

<bundles_post_ra>
// kernel: fwd.1
= control target key start
LH: loop header
LB: loop body
LE: loop exit
PB: predicated region body
PF: predicated region fallthrough
CT: control target
= control target key end

     0   :  { %18 = vsyncpa [#allocation3], 0  ;;  %s4266_s0 = inlined_call_operand.vmem [shape: f32[16,32], index: 0, kind: input, shape index: {}]   ;;  %s4267_s1 = inlined_call_operand.vmem [shape: bf16[32,128], index: 1, kind: input, shape index: {}]   ;;  %s4268_s2 = inlined_call_operand.vmem [shape: f32[1,128], index: 2, kind: input, shape index: {}]   ;;  %s4269_s3 = inlined_call_operand.hbm [shape: bf16[4,128,128], index: 3, kind: input, shape index: {}]   ;;  %s4270_s4 = inlined_call_operand.vmem [shape: f32[4,128], index: 4, kind: input, shape index: {}]   ;;  %s4271_s5 = inlined_call_operand.hbm [shape: bf16[128,128], index: 5, kind: input, shape index: {}]   ;;  %s4272_s6 = inlined_call_operand.vmem [shape: f32[1,128], index: 6, kind: input, shape index: {}]   ;;  %s4273_s7 = inlined_call_operand.hbm [shape: bf16[128,384], index: 7, kind: input, shape index: {}]   ;;  %s4274_s8 = inlined_call_operand.vmem [shape: f32[1,384], index: 8, kind: input, shape index: {}]   ;;  %s4275_s9 = inlined_call_operand.hbm [shape: bf16[2,384,384], index: 9, kind: input, shape index: {}]   ;;  %s4276_s10 = inlined_call_operand.vmem [shape: f32[2,384], index: 10, kind: input, shape index: {}]   ;;  %s4277_s11 = inlined_call_operand.hbm [shape: bf16[384,256], index: 11, kind: input, shape index: {}]   ;;  %s4278_s12 = inlined_call_operand.hbm [shape: f32[1,256], index: 12, kind: input, shape index: {}]   ;;  %s4279_s13 = inlined_call_operand.vmem [shape: f32[16,256], index: 13, kind: output, shape index: {}]  }
   0x1   :  { %19 = vsyncpa [#allocation5], 0 }
   0x2   :  { %20 = vsyncpa [#allocation8], 0 }
   0x3   :  { %21 = vsyncpa [#allocation11], 0  ;;  %s3865_s25 = smov [#allocation4]   ;;  %s3725_s29 = scalar_lea.hbm %s4271_s5, 1024 }
   0x4   :  { %s47_s26 = sshll.u32 %s3865_s25, 4  ;;  %p3726_p0 = scmp.ne.s32.totalorder %s4271_s5, %s3725_s29  ;;  %s48_s26 = int_to_ptr.vmem [resolvable:$true] %s47_s26 }
   0x5   :  { %p3729_p1 = scmp.lt.u32.totalorder %s3725_s29, %s4271_s5 }
   0x7   :  { %p3731_p2 = pnand %p3729_p1, %p3726_p0 }
   0x9   :  { %3734 = shalt.err (!%p3731_p2)
}
   0xa   :  { %s3735_s17 = scalar_lea.vmem %s48_s26, 1024  ;;  %p3740_p4 = scmp.lt.s32.totalorder %s48_s26, %s48_s26 }
   0xb   :  { %p3736_p3 = scmp.ne.s32.totalorder %s48_s26, %s3735_s17  ;;  %p3741_p5 = scmp.lt.s32.totalorder %s3735_s17, %s3735_s17 }
   0xd   :  { %p3742_p6 = por %p3741_p5, %p3740_p4 }
   0xf   :  { %p3743_p7 = pnand %p3742_p6, %p3736_p3 }
  0x11   :  { %3746 = shalt.err (!%p3743_p7)
}
  0x12   :  { %s3866_s18 = smov 64   ;;  %s3867_s19 = smov 4  }
  0x13   :  { %53 = dma.hbm_to_vmem [thread:$0]  %s4271_s5, 1024, %s48_s26, [#allocation5], %s3866_s18, %s3866_s18, %s3867_s19  }
  0x14   :  { %s3868_s22 = smov [#allocation7]   ;;  %s3869_s24 = smov [#allocation2]  }
  0x15   :  { %s75_s23 = sshll.u32 %s3868_s22, 4  ;;  %s33_s25 = sshll.u32 %s3869_s24, 4  ;;  %s76_s23 = int_to_ptr.vmem [resolvable:$true] %s75_s23  ;;  %s34_s25 = int_to_ptr.vmem [resolvable:$true] %s33_s25 }
  0x16   :  { %s3747_s29 = scalar_lea.hbm %s4275_s9, 18432 }
  0x17   :  { %p3748_p8 = scmp.ne.s32.totalorder %s4275_s9, %s3747_s29  ;;  %p3751_p9 = scmp.lt.u32.totalorder %s3747_s29, %s4275_s9 }
  0x19   :  { %p3753_p10 = pnand %p3751_p9, %p3748_p8 }
  0x1b   :  { %3756 = shalt.err (!%p3753_p10)
}
  0x1c   :  { %s3757_s5 = scalar_lea.vmem %s76_s23, 18432  ;;  %p3762_p12 = scmp.lt.s32.totalorder %s76_s23, %s76_s23 }
  0x1d   :  { %p3758_p11 = scmp.ne.s32.totalorder %s76_s23, %s3757_s5  ;;  %p3763_p13 = scmp.lt.s32.totalorder %s3757_s5, %s3757_s5 }
  0x1f   :  { %p3764_p0 = por %p3763_p13, %p3762_p12 }
  0x21   :  { %p3765_p1 = pnand %p3764_p0, %p3758_p11 }
  0x23   :  { %3768 = shalt.err (!%p3765_p1)
}
  0x24   :  { %s3870_s26 = smov 192   ;;  %s3871_s17 = smov 12  }
  0x25   :  { %81 = dma.hbm_to_vmem [thread:$0]  %s4275_s9, 18432, %s76_s23, [#allocation8], %s3870_s26, %s3870_s26, %s3871_s17  }
  0x26   :  { %s3769_s27 = scalar_lea.hbm %s4269_s3, 4096 }
  0x27   :  { %p3770_p2 = scmp.ne.s32.totalorder %s4269_s3, %s3769_s27  ;;  %p3773_p3 = scmp.lt.u32.totalorder %s3769_s27, %s4269_s3 }
  0x29   :  { %p3775_p4 = pnand %p3773_p3, %p3770_p2 }
  0x2b   :  { %3778 = shalt.err (!%p3775_p4)
}
  0x2c   :  { %s3779_s15 = scalar_lea.vmem %s34_s25, 4096  ;;  %p3784_p6 = scmp.lt.s32.totalorder %s34_s25, %s34_s25 }
  0x2d   :  { %p3780_p5 = scmp.ne.s32.totalorder %s34_s25, %s3779_s15  ;;  %p3785_p7 = scmp.lt.s32.totalorder %s3779_s15, %s3779_s15 }
  0x2f   :  { %p3786_p8 = por %p3785_p7, %p3784_p6 }
  0x31   :  { %p3787_p9 = pnand %p3786_p8, %p3780_p5 }
  0x33   :  { %3790 = shalt.err (!%p3787_p9)
}
  0x34   :  { %39 = dma.hbm_to_vmem [thread:$0]  %s4269_s3, 4096, %s34_s25, [#allocation3], %s3866_s18, %s3866_s18, %s3867_s19  }
  0x35   :  { %s3872_s16 = smov [#allocation6]   ;;  %s3873_s20 = smov [#allocation9]  }
  0x36   :  { %s61_s5 = sshll.u32 %s3872_s16, 4  ;;  %s89_s21 = sshll.u32 %s3873_s20, 4  ;;  %s62_s5 = int_to_ptr.vmem [resolvable:$true] %s61_s5  ;;  %s90_s21 = int_to_ptr.vmem [resolvable:$true] %s89_s21 }
  0x37   :  { %s3791_s27 = scalar_lea.hbm %s4273_s7, 3072 }
  0x38   :  { %p3792_p10 = scmp.ne.s32.totalorder %s4273_s7, %s3791_s27  ;;  %p3795_p11 = scmp.lt.u32.totalorder %s3791_s27, %s4273_s7 }
  0x3a   :  { %p3797_p12 = pnand %p3795_p11, %p3792_p10 }
  0x3c   :  { %3800 = shalt.err (!%p3797_p12)
}
  0x3d   :  { %s3801_s3 = scalar_lea.vmem %s62_s5, 3072  ;;  %p3806_p0 = scmp.lt.s32.totalorder %s62_s5, %s62_s5 }
  0x3e   :  { %p3802_p13 = scmp.ne.s32.totalorder %s62_s5, %s3801_s3  ;;  %p3807_p1 = scmp.lt.s32.totalorder %s3801_s3, %s3801_s3 }
  0x40   :  { %p3808_p2 = por %p3807_p1, %p3806_p0 }
  0x42   :  { %p3809_p3 = pnand %p3808_p2, %p3802_p13 }
  0x44   :  { %3812 = shalt.err (!%p3809_p3)
}
  0x45   :  { %67 = dma.hbm_to_vmem [thread:$0]  %s4273_s7, 3072, %s62_s5, [#allocation5], %s3870_s26, %s3870_s26, %s3871_s17  }
  0x46   :  { %s3813_s9 = scalar_lea.hbm %s4277_s11, 6144 }
  0x47   :  { %p3814_p4 = scmp.ne.s32.totalorder %s4277_s11, %s3813_s9  ;;  %p3817_p5 = scmp.lt.u32.totalorder %s3813_s9, %s4277_s11 }
  0x49   :  { %p3819_p6 = pnand %p3817_p5, %p3814_p4 }
  0x4b   :  { %3822 = shalt.err (!%p3819_p6)
}
  0x4c   :  { %s3823_s24 = scalar_lea.vmem %s90_s21, 6144  ;;  %p3828_p8 = scmp.lt.s32.totalorder %s90_s21, %s90_s21 }
  0x4d   :  { %p3824_p7 = scmp.ne.s32.totalorder %s90_s21, %s3823_s24  ;;  %p3829_p9 = scmp.lt.s32.totalorder %s3823_s24, %s3823_s24 }
  0x4f   :  { %p3830_p10 = por %p3829_p9, %p3828_p8 }
  0x51   :  { %p3831_p11 = pnand %p3830_p10, %p3824_p7 }
  0x53   :  { %3834 = shalt.err (!%p3831_p11)
}
  0x54   :  { %s3874_s7 = smov 128   ;;  %s3875_s26 = smov 8  }
  0x55   :  { %95 = dma.hbm_to_vmem [thread:$0]  %s4277_s11, 6144, %s90_s21, [#allocation8], %s3874_s7, %s3874_s7, %s3875_s26  }
  0x56   :  { %s3876_s27 = smov [#allocation10]   ;;  %s3835_s14 = scalar_lea.hbm %s4278_s12, 32 }
  0x57   :  { %s102_s28 = sshll.u32 %s3876_s27, 4  ;;  %p3836_p12 = scmp.ne.s32.totalorder %s4278_s12, %s3835_s14  ;;  %s103_s28 = int_to_ptr.vmem [resolvable:$true] %s102_s28 }
  0x58   :  { %p3839_p13 = scmp.lt.u32.totalorder %s3835_s14, %s4278_s12 }
  0x5a   :  { %p3841_p0 = pnand %p3839_p13, %p3836_p12 }
  0x5c   :  { %3844 = shalt.err (!%p3841_p0)
}
  0x5d   :  { %s3845_s15 = scalar_lea.vmem %s103_s28, 32  ;;  %p3850_p2 = scmp.lt.s32.totalorder %s103_s28, %s103_s28 }
  0x5e   :  { %p3846_p1 = scmp.ne.s32.totalorder %s103_s28, %s3845_s15  ;;  %p3851_p3 = scmp.lt.s32.totalorder %s3845_s15, %s3845_s15 }
  0x60   :  { %p3852_p4 = por %p3851_p3, %p3850_p2 }
  0x62   :  { %p3853_p5 = pnand %p3852_p4, %p3846_p1 }
  0x64   :  { %3856 = shalt.err (!%p3853_p5)
}
  0x65   :  { %105 = dma.hbm_to_vmem [thread:$0]  %s4278_s12, 32, %s103_s28, [#allocation11]  }
  0x66   :  { %3857 = dma.done.wait [#allocation3], 4096  }
  0x67   :  { %3858 = vsyncadd [#allocation3], 4294963200 }
  0x68   :  { %3859 = dma.done.wait [#allocation5], 4096  }
  0x69   :  { %3860 = vsyncadd [#allocation5], 4294963200 }
  0x6a   :  { %3861 = dma.done.wait [#allocation8], 24576  }
  0x6b   :  { %3862 = vsyncadd [#allocation8], 4294942720 }
  0x6c   :  { %3863 = dma.done.wait [#allocation11], 32  }
  0x6d   :  { %3864 = vsyncadd [#allocation11], 4294967264  ;;  %v3877_v0 = vmov 0.0   ;;  %vm3878_vm0 = vmmov 0   ;;  %v3387_v1 = vld [vmem:[%s4267_s1] sm:$0xff]   ;;  %v3388_v2 = vld [vmem:[%s4267_s1 + $0x8] sm:$0xff]  }
  0x6e   :  { %3180 = vmatprep.subr.bf16.mxu0 %v3877_v0  ;;  %3184 = vmatprep.mubr.msk.bf16.mxu0 %vm3878_vm0, %v3877_v0  ;;  %v125_v3 = vld [vmem:[%s4266_s0] sm:$0xff]  ;;  %v126_v4 = vld [vmem:[%s4266_s0 + $0x8] sm:$0xff]  ;;  %vm151_vm1 = vcmask 261120   ;;  %v3391_v8 = vld [vmem:[#allocation2 + $0x10] sm:$0xff]  }
  0x6f   :  { %3188 = vmatprep.subr.bf16.mxu1 %v3877_v0  ;;  %3204 = vmatprep.mubr.msk.bf16.mxu1 %vm3878_vm0, %v3877_v0  ;;  %v3389_v5 = vld [vmem:[#allocation2] sm:$0xff]   ;;  %v132_v6 = vpack.c.bf16 %v126_v4, %v125_v3  ;;  %v3390_v7 = vld [vmem:[#allocation2 + $0x8] sm:$0xff]   ;;  %v3392_v9 = vld [vmem:[#allocation2 + $0x18] sm:$0xff]  }
  0x70   :  { %3181 = vmatpush3.bf16.msra.mxu0 %v3387_v1  ;;  %3189 = vmatpush3.bf16.msra.mxu1 %v3389_v5  ;;  %v3393_v10 = vld [vmem:[#allocation2 + $0x20] sm:$0xff]   ;;  %v3394_v11 = vld [vmem:[#allocation2 + $0x28] sm:$0xff]   ;;  %v3395_v12 = vld [vmem:[#allocation2 + $0x30] sm:$0xff]  }
  0x71   :  { %3182 = vmatprep.subr.bf16.mxu0 %v3877_v0  ;;  %3190 = vmatprep.subr.bf16.mxu1 %v3877_v0  ;;  %v3396_v13 = vld [vmem:[#allocation2 + $0x38] sm:$0xff]   ;;  %v2795_v14 = vld [vmem:[%s4268_s2] ss:$0 sm:$0xff]  ;;  %v3398_v25 = vld [vmem:[#allocation2 + $0x48] sm:$0xff]  }
  0x72   :  { %v3397_v23 = vld [vmem:[#allocation2 + $0x40] sm:$0xff]   ;;  %v3399_v26 = vld [vmem:[#allocation2 + $0x50] sm:$0xff]   ;;  %v3400_v27 = vld [vmem:[#allocation2 + $0x58] sm:$0xff]  }
  0x73   :  { %v3401_v28 = vld [vmem:[#allocation2 + $0x60] sm:$0xff]   ;;  %v3402_v29 = vld [vmem:[#allocation2 + $0x68] sm:$0xff]   ;;  %v3403_v30 = vld [vmem:[#allocation2 + $0x70] sm:$0xff]  }
  0x74   :  { %3183 = vmatpush3.bf16.msra.mxu0 %v3388_v2  ;;  %3191 = vmatpush3.bf16.msra.mxu1 %v3390_v7  ;;  %v3404_v31 = vld [vmem:[#allocation2 + $0x78] sm:$0xff]   ;;  %v2799_v32 = vld [vmem:[%s4270_s4] ss:$0 sm:$0xff]  ;;  %v3406_v43 = vld [vmem:[#allocation2 + $0x88] sm:$0xff]  }
  0x75   :  { %3248 = vmatprep.subr.bf16.mxu0 %v3877_v0  ;;  %3192 = vmatprep.subr.bf16.mxu1 %v3877_v0  ;;  %v3405_v41 = vld [vmem:[#allocation2 + $0x80] sm:$0xff]   ;;  %v3407_v44 = vld [vmem:[#allocation2 + $0x90] sm:$0xff]   ;;  %v3408_v45 = vld [vmem:[#allocation2 + $0x98] sm:$0xff]  }
  0x76   :  { %v3409_v46 = vld [vmem:[#allocation2 + $0xa0] sm:$0xff]   ;;  %v3410_v47 = vld [vmem:[#allocation2 + $0xa8] sm:$0xff]   ;;  %v3411_v48 = vld [vmem:[#allocation2 + $0xb0] sm:$0xff]  }
  0x77   :  { %3185 = vmatmul.mubr.msk.bf16.vlgmr.msra.gmra.mrb[0].mxu0 %vm151_vm1, %v132_v6  ;;  %v3412_v49 = vld [vmem:[#allocation2 + $0xb8] sm:$0xff]   ;;  %v3413_v50 = vld [vmem:[#allocation2 + $0xc0] sm:$0xff]   ;;  %v3414_v51 = vld [vmem:[#allocation2 + $0xc8] sm:$0xff]  }
  0x78   :  { %3264 = vmatprep.mubr.msk.bf16.mxu0 %vm3878_vm0, %v3877_v0  ;;  %3193 = vmatpush3.bf16.msra.mxu1 %v3391_v8  ;;  %v3415_v52 = vld [vmem:[#allocation2 + $0xd0] sm:$0xff]   ;;  %v3416_v53 = vld [vmem:[#allocation2 + $0xd8] sm:$0xff]   ;;  %v3417_v54 = vld [vmem:[#allocation2 + $0xe0] sm:$0xff]  }
  0x79   :  { %3194 = vmatprep.subr.bf16.mxu1 %v3877_v0  ;;  %3249 = vmatpush3.bf16.msra.mxu0 %v3413_v50  ;;  %v3418_v55 = vld [vmem:[#allocation2 + $0xe8] sm:$0xff]   ;;  %v2808_v56 = vld [vmem:[%s4270_s4 + $0x1] ss:$0 sm:$0xff]  ;;  %v3419_v5 = vld [vmem:[#allocation2 + $0xf0] sm:$0xff]  }
  0x7a   :  { %3250 = vmatprep.subr.bf16.mxu0 %v3877_v0  ;;  %v3420_v6 = vld [vmem:[#allocation2 + $0xf8] sm:$0xff]   ;;  %v3421_v7 = vld [vmem:[#allocation4] sm:$0xff]   ;;  %v3422_v8 = vld [vmem:[#allocation4 + $0x8] sm:$0xff]  }
  0x7b   :  { %v3432_v50 = vld [vmem:[#allocation6 + $0x8] ss:$12 sps:$4 sm:$0xff]  }
  0x7c   :  { %3195 = vmatpush3.bf16.msra.mxu1 %v3392_v9  ;;  %v3423_v9 = vld [vmem:[#allocation4 + $0x10] sm:$0xff]  }
  0x7d   :  { %3196 = vmatprep.subr.bf16.mxu1 %v3877_v0  ;;  %3251 = vmatpush3.bf16.msra.mxu0 %v3414_v51 }
  0x7e   :  { %3252 = vmatprep.subr.bf16.mxu0 %v3877_v0 }
  0x80   :  { %3197 = vmatpush3.bf16.msra.mxu1 %v3393_v10  ;;  %v3424_v10 = vld [vmem:[#allocation4 + $0x18] sm:$0xff]  }
  0x81   :  { %3198 = vmatprep.subr.bf16.mxu1 %v3877_v0  ;;  %3253 = vmatpush3.bf16.msra.mxu0 %v3415_v52  ;;  %v3436_v52 = vld [vmem:[#allocation6 + $0x20] ss:$12 sps:$4 sm:$0xff]  }
  0x82   :  { %3254 = vmatprep.subr.bf16.mxu0 %v3877_v0 }
  0x84   :  { %3199 = vmatpush3.bf16.msra.mxu1 %v3394_v11  ;;  %v3425_v11 = vld [vmem:[#allocation4 + $0x20] sm:$0xff]  }
  0x85   :  { %3200 = vmatprep.subr.bf16.mxu1 %v3877_v0  ;;  %3255 = vmatpush3.bf16.msra.mxu0 %v3416_v53  ;;  %v3440_v53 = vld [vmem:[#allocation6 + $0x38] ss:$12 sps:$4 sm:$0xff]  }
  0x86   :  { %3256 = vmatprep.subr.bf16.mxu0 %v3877_v0 }
  0x88   :  { %3201 = vmatpush3.bf16.msra.mxu1 %v3395_v12  ;;  %v2817_v12 = vld [vmem:[%s4270_s4 + $0x2] ss:$0 sm:$0xff] }
  0x89   :  { %3202 = vmatprep.subr.bf16.mxu1 %v3877_v0  ;;  %3257 = vmatpush3.bf16.msra.mxu0 %v3417_v54  ;;  %v3444_v54 = vld [vmem:[#allocation6 + $0x50] ss:$12 sps:$4 sm:$0xff]  }
  0x8a   :  { %3258 = vmatprep.subr.bf16.mxu0 %v3877_v0 }
  0x8c   :  { %3203 = vmatpush3.bf16.msra.mxu1 %v3396_v13 }
  0x8d   :  { %3208 = vmatprep.subr.bf16.mxu1 %v3877_v0  ;;  %3259 = vmatpush3.bf16.msra.mxu0 %v3418_v55  ;;  %v3448_v55 = vld [vmem:[#allocation6 + $0x68] ss:$12 sps:$4 sm:$0xff]  }
  0x8e   :  { %3260 = vmatprep.subr.bf16.mxu0 %v3877_v0 }
  0x91   :  { %3261 = vmatpush3.bf16.msra.mxu0 %v3419_v5 }
  0x92   :  { %3262 = vmatprep.subr.bf16.mxu0 %v3877_v0 }
  0x95   :  { %3263 = vmatpush3.bf16.msra.mxu0 %v3420_v6 }
 0x14a   :  { %v189_v15 = vpop.f32.mrb[0].mxu0 }
 0x14b   :  { %v4067_v16 = vadd.f32 %v2795_v14, %v189_v15  ;;  %v3186_v17 = vpop.f32.mrb[1].mxu0 }
 0x14c   :  { %v192_v18 = vpop.f32.mrb[2].mxu0 }
 0x14d   :  { %v4069_v19 = vadd.f32 %v2795_v14, %v192_v18  ;;  %v3187_v20 = vpop.f32.mrb[3].mxu0  ;;  %v196_v21 = vmax.f32 %v4067_v16, 0.0 }
 0x14f   :  { %v197_v22 = vmax.f32 %v4069_v19, 0.0 }
 0x151   :  { %v215_v24 = vpack.c.bf16 %v197_v22, %v196_v21 }
 0x153   :  { %3205 = vmatmul.mubr.bf16.vlgmr.msra.gmra.mrb[0].mxu1 %v215_v24  ;;  %v3428_v24 = vld [vmem:[#allocation4 + $0x38] sm:$0xff]  }
 0x154   :  { %3209 = vmatpush3.bf16.msra.mxu1 %v3397_v23  ;;  %3224 = vmatprep.mubr.msk.bf16.mxu1 %vm3878_vm0, %v3877_v0  ;;  %v3427_v23 = vld [vmem:[#allocation4 + $0x30] sm:$0xff]  }
 0x155   :  { %3210 = vmatprep.subr.bf16.mxu1 %v3877_v0 }
 0x158   :  { %3211 = vmatpush3.bf16.msra.mxu1 %v3398_v25  ;;  %v3429_v25 = vld [vmem:[#allocation6] ss:$12 sps:$4 sm:$0xff]  }
 0x159   :  { %3212 = vmatprep.subr.bf16.mxu1 %v3877_v0 }
 0x15c   :  { %3213 = vmatpush3.bf16.msra.mxu1 %v3399_v26  ;;  %v3431_v26 = vld [vmem:[#allocation6 + $0x4] ss:$12 sps:$4 sm:$0xff]  }
 0x15d   :  { %3214 = vmatprep.subr.bf16.mxu1 %v3877_v0  ;;  %948 = vmatprep.subr.bf16.mxu0 %v3431_v26  ;;  %v3509_v26 = vld [vmem:[#allocation7 + $0x68] ss:$12 sps:$4 sm:$0xff]  }
 0x160   :  { %3215 = vmatpush3.bf16.msra.mxu1 %v3400_v27  ;;  %v3435_v27 = vld [vmem:[#allocation6 + $0x1c] ss:$12 sps:$4 sm:$0xff]  }
 0x161   :  { %3216 = vmatprep.subr.bf16.mxu1 %v3877_v0 }
 0x164   :  { %3217 = vmatpush3.bf16.msra.mxu1 %v3401_v28  ;;  %v3433_v28 = vld [vmem:[#allocation6 + $0x18] ss:$12 sps:$4 sm:$0xff]  }
 0x165   :  { %3218 = vmatprep.subr.bf16.mxu1 %v3877_v0 }
 0x168   :  { %3219 = vmatpush3.bf16.msra.mxu1 %v3402_v29  ;;  %v3439_v29 = vld [vmem:[#allocation6 + $0x34] ss:$12 sps:$4 sm:$0xff]  }
 0x169   :  { %3220 = vmatprep.subr.bf16.mxu1 %v3877_v0 }
 0x16c   :  { %3221 = vmatpush3.bf16.msra.mxu1 %v3403_v30  ;;  %v3437_v30 = vld [vmem:[#allocation6 + $0x30] ss:$12 sps:$4 sm:$0xff]  }
 0x16d   :  { %3222 = vmatprep.subr.bf16.mxu1 %v3877_v0 }
 0x170   :  { %3223 = vmatpush3.bf16.msra.mxu1 %v3404_v31  ;;  %v3443_v31 = vld [vmem:[#allocation6 + $0x4c] ss:$12 sps:$4 sm:$0xff]  }
 0x171   :  { %3228 = vmatprep.subr.bf16.mxu1 %v3877_v0 }
 0x226   :  { %v302_v33 = vpop.f32.mrb[0].mxu1 }
 0x227   :  { %v303_v34 = vadd.f32 %v2799_v32, %v302_v33  ;;  %v3206_v35 = vpop.f32.mrb[1].mxu1  ;;  %v3447_v33 = vld [vmem:[#allocation6 + $0x64] ss:$12 sps:$4 sm:$0xff]  }
 0x228   :  { %v305_v36 = vpop.f32.mrb[2].mxu1  ;;  %v3451_v35 = vld [vmem:[#allocation6 + $0x7c] ss:$12 sps:$4 sm:$0xff]  }
 0x229   :  { %v306_v37 = vadd.f32 %v2799_v32, %v305_v36  ;;  %v3207_v38 = vpop.f32.mrb[3].mxu1  ;;  %v309_v39 = vmax.f32 %v303_v34, 0.0  ;;  %v3441_v32 = vld [vmem:[#allocation6 + $0x48] ss:$12 sps:$4 sm:$0xff]   ;;  %v3445_v34 = vld [vmem:[#allocation6 + $0x60] ss:$12 sps:$4 sm:$0xff]  }
 0x22a   :  { %v3449_v36 = vld [vmem:[#allocation6 + $0x78] ss:$12 sps:$4 sm:$0xff]   ;;  %v3453_v38 = vld [vmem:[#allocation6 + $0x90] ss:$12 sps:$4 sm:$0xff]  }
 0x22b   :  { %v310_v40 = vmax.f32 %v306_v37, 0.0  ;;  %v3455_v37 = vld [vmem:[#allocation6 + $0x94] ss:$12 sps:$4 sm:$0xff]  }
 0x22d   :  { %v329_v42 = vpack.c.bf16 %v310_v40, %v309_v39  ;;  %v2826_v39 = vld [vmem:[%s4270_s4 + $0x3] ss:$0 sm:$0xff] }
 0x22f   :  { %3225 = vmatmul.mubr.bf16.vlgmr.msra.gmra.mrb[4].mxu1 %v329_v42 }
 0x230   :  { %3229 = vmatpush3.bf16.msra.mxu1 %v3405_v41  ;;  %3244 = vmatprep.mubr.msk.bf16.mxu1 %vm3878_vm0, %v3877_v0 }
 0x231   :  { %3230 = vmatprep.subr.bf16.mxu1 %v3877_v0 }
 0x234   :  { %3231 = vmatpush3.bf16.msra.mxu1 %v3406_v43 }
 0x235   :  { %3232 = vmatprep.subr.bf16.mxu1 %v3877_v0 }
 0x238   :  { %3233 = vmatpush3.bf16.msra.mxu1 %v3407_v44 }
 0x239   :  { %3234 = vmatprep.subr.bf16.mxu1 %v3877_v0 }
 0x23c   :  { %3235 = vmatpush3.bf16.msra.mxu1 %v3408_v45 }
 0x23d   :  { %3236 = vmatprep.subr.bf16.mxu1 %v3877_v0 }
 0x240   :  { %3237 = vmatpush3.bf16.msra.mxu1 %v3409_v46 }
 0x241   :  { %3238 = vmatprep.subr.bf16.mxu1 %v3877_v0 }
 0x244   :  { %3239 = vmatpush3.bf16.msra.mxu1 %v3410_v47 }
 0x245   :  { %3240 = vmatprep.subr.bf16.mxu1 %v3877_v0 }
 0x248   :  { %3241 = vmatpush3.bf16.msra.mxu1 %v3411_v48 }
 0x249   :  { %3242 = vmatprep.subr.bf16.mxu1 %v3877_v0 }
 0x24c   :  { %3243 = vmatpush3.bf16.msra.mxu1 %v3412_v49 }
 0x24d   :  { %3268 = vmatprep.subr.bf16.mxu1 %v3877_v0 }
 0x302   :  { %v416_v57 = vpop.f32.mrb[4].mxu1 }
 0x303   :  { %v417_v58 = vadd.f32 %v2808_v56, %v416_v57  ;;  %v3226_v59 = vpop.f32.mrb[5].mxu1  ;;  %v3456_v57 = vld [vmem:[#allocation6 + $0x98] ss:$12 sps:$4 sm:$0xff]  }
 0x304   :  { %v419_v60 = vpop.f32.mrb[6].mxu1  ;;  %v3457_v59 = vld [vmem:[#allocation6 + $0xa8] ss:$12 sps:$4 sm:$0xff]  }
 0x305   :  { %v423_v61 = vmax.f32 %v417_v58, 0.0  ;;  %v420_v62 = vadd.f32 %v2808_v56, %v419_v60  ;;  %v3227_v63 = vpop.f32.mrb[7].mxu1  ;;  %v3452_v56 = vld [vmem:[#allocation6 + $0x80] ss:$12 sps:$4 sm:$0xff]   ;;  %v3460_v60 = vld [vmem:[#allocation6 + $0xb0] ss:$12 sps:$4 sm:$0xff]  }
 0x306   :  { %v3459_v58 = vld [vmem:[#allocation6 + $0xac] ss:$12 sps:$4 sm:$0xff]   ;;  %v3488_v63 = vld [vmem:[#allocation7 + $0xc8] ss:$12 sps:$4 sm:$0xff]  }
 0x307   :  { %v424_v1 = vmax.f32 %v420_v62, 0.0  ;;  %v4111_v2 = vadd.f32 %v423_v61, %v196_v21  ;;  %v3879_v61 = vmov 0   ;;  %v3463_v62 = vld [vmem:[#allocation7 + $0x4] ss:$12 sps:$4 sm:$0xff]  }
 0x309   :  { %v4115_v3 = vadd.f32 %v424_v1, %v197_v22  ;;  %v3426_v22 = vld [vmem:[#allocation4 + $0x28] sm:$0xff]   ;;  %v2835_v1 = vld [vmem:[%s4272_s6] ss:$0 sm:$0xff] }
 0x30b   :  { %v445_v4 = vpack.c.bf16 %v4115_v3, %v4111_v2 }
 0x30d   :  { %3245 = vmatmul.mubr.bf16.vlgmr.msra.gmra.mrb[8].mxu1 %v445_v4 }
 0x30e   :  { %3284 = vmatprep.mubr.msk.bf16.mxu1 %vm3878_vm0, %v3877_v0  ;;  %3269 = vmatpush3.bf16.msra.mxu1 %v3421_v7 }
 0x30f   :  { %3270 = vmatprep.subr.bf16.mxu1 %v3877_v0 }
 0x312   :  { %3271 = vmatpush3.bf16.msra.mxu1 %v3422_v8  ;;  %v3461_v8 = vld [vmem:[#allocation7] ss:$12 sps:$4 sm:$0xff]  }
 0x313   :  { %3272 = vmatprep.subr.bf16.mxu1 %v3877_v0 }
 0x316   :  { %3273 = vmatpush3.bf16.msra.mxu1 %v3423_v9  ;;  %v3489_v9 = vld [vmem:[#allocation7 + $0x8] ss:$12 sps:$4 sm:$0xff]  }
 0x317   :  { %3274 = vmatprep.subr.bf16.mxu1 %v3877_v0 }
 0x31a   :  { %3275 = vmatpush3.bf16.msra.mxu1 %v3424_v10 }
 0x31b   :  { %3276 = vmatprep.subr.bf16.mxu1 %v3877_v0 }
 0x31e   :  { %3277 = vmatpush3.bf16.msra.mxu1 %v3425_v11  ;;  %v3466_v11 = vld [vmem:[#allocation7 + $0x1c] ss:$12 sps:$4 sm:$0xff]  }
 0x31f   :  { %3278 = vmatprep.subr.bf16.mxu1 %v3877_v0 }
 0x322   :  { %3279 = vmatpush3.bf16.msra.mxu1 %v3426_v22  ;;  %v3504_v22 = vld [vmem:[#allocation7 + $0x50] ss:$12 sps:$4 sm:$0xff]  }
 0x323   :  { %3280 = vmatprep.subr.bf16.mxu1 %v3877_v0 }
 0x326   :  { %3281 = vmatpush3.bf16.msra.mxu1 %v3427_v23  ;;  %v3475_v23 = vld [vmem:[#allocation7 + $0x64] ss:$12 sps:$4 sm:$0xff]  }
 0x327   :  { %3282 = vmatprep.subr.bf16.mxu1 %v3877_v0 }
 0x32a   :  { %3283 = vmatpush3.bf16.msra.mxu1 %v3428_v24  ;;  %v3508_v24 = vld [vmem:[#allocation7 + $0x128] ss:$12 sps:$4 sm:$0xff]  }
 0x32b   :  { %3288 = vmatprep.subr.bf16.mxu1 %v3877_v0 }
 0x3e0   :  { %v532_v13 = vpop.f32.mrb[8].mxu1 }
 0x3e1   :  { %v533_v14 = vadd.f32 %v2817_v12, %v532_v13  ;;  %v3246_v15 = vpop.f32.mrb[9].mxu1  ;;  %v3464_v13 = vld [vmem:[#allocation7 + $0x18] ss:$12 sps:$4 sm:$0xff]  }
 0x3e2   :  { %v535_v16 = vpop.f32.mrb[10].mxu1  ;;  %v3469_v15 = vld [vmem:[#allocation7 + $0x34] ss:$12 sps:$4 sm:$0xff]  }
 0x3e3   :  { %v536_v17 = vadd.f32 %v2817_v12, %v535_v16  ;;  %v3247_v18 = vpop.f32.mrb[11].mxu1  ;;  %v539_v19 = vmax.f32 %v533_v14, 0.0  ;;  %v3493_v12 = vld [vmem:[#allocation7 + $0xe0] ss:$12 sps:$4 sm:$0xff]   ;;  %v3498_v16 = vld [vmem:[#allocation7 + $0xf8] ss:$12 sps:$4 sm:$0xff]  }
 0x3e4   :  { %v3494_v14 = vld [vmem:[#allocation7 + $0x20] ss:$12 sps:$4 sm:$0xff]   ;;  %v3499_v18 = vld [vmem:[#allocation7 + $0x38] ss:$12 sps:$4 sm:$0xff]  }
 0x3e5   :  { %v540_v20 = vmax.f32 %v536_v17, 0.0  ;;  %v3467_v17 = vld [vmem:[#allocation7 + $0x30] ss:$12 sps:$4 sm:$0xff]  }
 0x3e7   :  { %v559_v21 = vpack.c.bf16 %v540_v20, %v539_v19  ;;  %v3472_v19 = vld [vmem:[#allocation7 + $0x4c] ss:$12 sps:$4 sm:$0xff]   ;;  %v3503_v20 = vld [vmem:[#allocation7 + $0x110] ss:$12 sps:$4 sm:$0xff]  }
 0x3e9   :  { %3265 = vmatmul.mubr.bf16.vlgmr.msra.gmra.mrb[4].mxu0 %v559_v21  ;;  %v3470_v21 = vld [vmem:[#allocation7 + $0x48] ss:$12 sps:$4 sm:$0xff]  }
 0x3ea   :  { %949 = vmatpush1.bf16.msra.mxu0 %v3429_v25  ;;  %980 = vmatprep.mubr.bf16.mxu0 %v3879_v61  ;;  %v3473_v25 = vld [vmem:[#allocation7 + $0x60] ss:$12 sps:$4 sm:$0xff]  }
 0x3eb   :  { %950 = vmatprep.subr.bf16.mxu0 %v3435_v27  ;;  %v3478_v27 = vld [vmem:[#allocation7 + $0x7c] ss:$12 sps:$4 sm:$0xff]  }
 0x3ee   :  { %951 = vmatpush1.bf16.msra.mxu0 %v3433_v28  ;;  %v3513_v28 = vld [vmem:[#allocation7 + $0x140] ss:$12 sps:$4 sm:$0xff]  }
 0x3ef   :  { %952 = vmatprep.subr.bf16.mxu0 %v3439_v29  ;;  %v3476_v29 = vld [vmem:[#allocation7 + $0x78] ss:$12 sps:$4 sm:$0xff]  }
 0x3f2   :  { %953 = vmatpush1.bf16.msra.mxu0 %v3437_v30  ;;  %v3514_v30 = vld [vmem:[#allocation7 + $0x80] ss:$12 sps:$4 sm:$0xff]  }
 0x3f3   :  { %954 = vmatprep.subr.bf16.mxu0 %v3443_v31  ;;  %v3481_v31 = vld [vmem:[#allocation7 + $0x94] ss:$12 sps:$4 sm:$0xff]  }
 0x3f6   :  { %955 = vmatpush1.bf16.msra.mxu0 %v3441_v32  ;;  %v3479_v32 = vld [vmem:[#allocation7 + $0x90] ss:$12 sps:$4 sm:$0xff]  }
 0x3f7   :  { %956 = vmatprep.subr.bf16.mxu0 %v3447_v33  ;;  %v3484_v33 = vld [vmem:[#allocation7 + $0xac] ss:$12 sps:$4 sm:$0xff]  }
 0x3fa   :  { %957 = vmatpush1.bf16.msra.mxu0 %v3445_v34  ;;  %v3482_v34 = vld [vmem:[#allocation7 + $0xa8] ss:$12 sps:$4 sm:$0xff]  }
 0x3fb   :  { %958 = vmatprep.subr.bf16.mxu0 %v3451_v35  ;;  %v3487_v35 = vld [vmem:[#allocation7 + $0xc4] ss:$12 sps:$4 sm:$0xff]  }
 0x3fe   :  { %959 = vmatpush1.bf16.msra.mxu0 %v3449_v36  ;;  %v3485_v36 = vld [vmem:[#allocation7 + $0xc0] ss:$12 sps:$4 sm:$0xff]  }
 0x3ff   :  { %960 = vmatprep.subr.bf16.mxu0 %v3455_v37  ;;  %v3492_v37 = vld [vmem:[#allocation7 + $0xdc] ss:$12 sps:$4 sm:$0xff]  }
 0x402   :  { %961 = vmatpush1.bf16.msra.mxu0 %v3453_v38  ;;  %v3490_v38 = vld [vmem:[#allocation7 + $0xd8] ss:$12 sps:$4 sm:$0xff]  }
 0x403   :  { %962 = vmatprep.subr.bf16.mxu0 %v3459_v58 }
 0x406   :  { %963 = vmatpush1.bf16.msra.mxu0 %v3457_v59  ;;  %v4157_v59 = vld [vmem:[%s4274_s8] sm:$0x7] }
 0x407   :  { %1538 = vmatprep.subr.bf16.mxu0 %v3463_v62 }
 0x4bc   :  { %v646_v40 = vpop.f32.mrb[4].mxu0 }
 0x4bd   :  { %v647_v41 = vadd.f32 %v2826_v39, %v646_v40  ;;  %v3266_v42 = vpop.f32.mrb[5].mxu0  ;;  %v3495_v40 = vld [vmem:[#allocation7 + $0xf0] ss:$12 sps:$4 sm:$0xff]  }
 0x4be   :  { %v649_v43 = vpop.f32.mrb[6].mxu0  ;;  %v3500_v42 = vld [vmem:[#allocation7 + $0x108] ss:$12 sps:$4 sm:$0xff]  }
 0x4bf   :  { %v653_v44 = vmax.f32 %v647_v41, 0.0  ;;  %v650_v45 = vadd.f32 %v2826_v39, %v649_v43  ;;  %v3267_v46 = vpop.f32.mrb[7].mxu0  ;;  %v3497_v39 = vld [vmem:[#allocation7 + $0xf4] ss:$12 sps:$4 sm:$0xff]   ;;  %v3502_v41 = vld [vmem:[#allocation7 + $0x10c] ss:$12 sps:$4 sm:$0xff]  }
 0x4c0   :  { %v3507_v43 = vld [vmem:[#allocation7 + $0x124] ss:$12 sps:$4 sm:$0xff]  }
 0x4c1   :  { %v654_v47 = vmax.f32 %v650_v45, 0.0  ;;  %v655_v48 = vadd.f32 %v653_v44, %v4111_v2  ;;  %v3505_v44 = vld [vmem:[#allocation7 + $0x120] ss:$12 sps:$4 sm:$0xff]   ;;  %v3512_v45 = vld [vmem:[#allocation7 + $0x13c] ss:$12 sps:$4 sm:$0xff]  }
 0x4c2   :  { %v3510_v46 = vld [vmem:[#allocation7 + $0x138] ss:$12 sps:$4 sm:$0xff]  }
 0x4c3   :  { %v656_v49 = vadd.f32 %v654_v47, %v4115_v3  ;;  %v3517_v47 = vld [vmem:[#allocation7 + $0x154] ss:$12 sps:$4 sm:$0xff]  }
 0x4c5   :  { %v674_v51 = vpack.c.bf16 %v656_v49, %v655_v48  ;;  %v3518_v48 = vld [vmem:[#allocation7 + $0x158] ss:$12 sps:$4 sm:$0xff]   ;;  %v3515_v49 = vld [vmem:[#allocation7 + $0x150] ss:$12 sps:$4 sm:$0xff]  }
 0x4c7   :  { %3285 = vmatmul.mubr.bf16.vlgmr.msra.gmra.mrb[12].mxu1 %v674_v51  ;;  %v3522_v51 = vld [vmem:[#allocation7 + $0x16c] ss:$12 sps:$4 sm:$0xff]  }
 0x4c8   :  { %3289 = vmatpush3.bf16.msra.mxu1 %v3432_v50  ;;  %3304 = vmatprep.mubr.msk.bf16.mxu1 %vm3878_vm0, %v3877_v0  ;;  %v3519_v50 = vld [vmem:[#allocation7 + $0x98] ss:$12 sps:$4 sm:$0xff]  }
 0x4c9   :  { %3290 = vmatprep.subr.bf16.mxu1 %v3877_v0 }
 0x4cc   :  { %3291 = vmatpush3.bf16.msra.mxu1 %v3436_v52  ;;  %v3523_v52 = vld [vmem:[#allocation7 + $0x170] ss:$12 sps:$4 sm:$0xff]  }
 0x4cd   :  { %3292 = vmatprep.subr.bf16.mxu1 %v3877_v0 }
 0x4d0   :  { %3293 = vmatpush3.bf16.msra.mxu1 %v3440_v53  ;;  %v3520_v53 = vld [vmem:[#allocation7 + $0x168] ss:$12 sps:$4 sm:$0xff]  }
 0x4d1   :  { %3294 = vmatprep.subr.bf16.mxu1 %v3877_v0 }
 0x4d4   :  { %3295 = vmatpush3.bf16.msra.mxu1 %v3444_v54  ;;  %v3524_v54 = vld [vmem:[#allocation7 + $0xb0] ss:$12 sps:$4 sm:$0xff]  }
 0x4d5   :  { %3296 = vmatprep.subr.bf16.mxu1 %v3877_v0 }
 0x4d8   :  { %3297 = vmatpush3.bf16.msra.mxu1 %v3448_v55  ;;  %v3527_v55 = vld [vmem:[#allocation7 + $0x184] ss:$12 sps:$4 sm:$0xff]  }
 0x4d9   :  { %3298 = vmatprep.subr.bf16.mxu1 %v3877_v0 }
 0x4dc   :  { %3299 = vmatpush3.bf16.msra.mxu1 %v3452_v56  ;;  %v805_v56 = vlaneseq }
 0x4dd   :  { %3300 = vmatprep.subr.bf16.mxu1 %v3877_v0 }
 0x4e0   :  { %3301 = vmatpush3.bf16.msra.mxu1 %v3456_v57  ;;  %v806_v57 = vshrl.u32 %v805_v56, 7  ;;  %v3566_v56 = vld [vmem:[#allocation7 + $0x288] ss:$12 sps:$4 sm:$0xff]  }
 0x4e1   :  { %3302 = vmatprep.subr.bf16.mxu1 %v3877_v0 }
 0x4e2   :  { %v4152_v58 = vsub.s32 1, %v806_v57 }
 0x4e4   :  { %3303 = vmatpush3.bf16.msra.mxu1 %v3460_v60  ;;  %v4159_v60 = vsub.s32 0, %v806_v57  ;;  %v812_v62 = vrot.slane %v4157_v59, %v4152_v58 }
 0x4e5   :  { %3118 = vmatprep.subr.bf16.mxu1 %v3488_v63 }
 0x4e6   :  { %v808_v63 = vrot.slane %v4157_v59, %v4159_v60 }
 0x59a   :  { %v763_v2 = vpop.f32.mrb[12].mxu1 }
 0x59b   :  { %v3286_v3 = vpop.f32.mrb[13].mxu1  ;;  %v764_v5 = vadd.f32 %v2835_v1, %v763_v2 }
 0x59c   :  { %v766_v4 = vpop.f32.mrb[14].mxu1 }
 0x59d   :  { %v767_v6 = vadd.f32 %v2835_v1, %v766_v4  ;;  %v3287_v7 = vpop.f32.mrb[15].mxu1 }
 0x59f   :  { %v803_v10 = vpack.c.bf16 %v767_v6, %v764_v5 }
 0x5a1   :  { %981 = vmatmul.mubr.bf16.vlgmr.msra.gmra.mrb[8].mxu0 %v803_v10  ;;  %3305 = vmatmul.mubr.bf16.vlgmr.msra.gmra.mrb[16].mxu1 %v803_v10 }
 0x5a2   :  { %1539 = vmatpush1.bf16.msra.mxu0 %v3461_v8  ;;  %3119 = vmatpush3.bf16.msra.mxu1 %v3489_v9 }
 0x5a3   :  { %1540 = vmatprep.subr.bf16.mxu0 %v3466_v11  ;;  %3120 = vmatprep.subr.bf16.mxu1 %v3493_v12 }
 0x5a6   :  { %1541 = vmatpush1.bf16.msra.mxu0 %v3464_v13  ;;  %3121 = vmatpush3.bf16.msra.mxu1 %v3494_v14 }
 0x5a7   :  { %1542 = vmatprep.subr.bf16.mxu0 %v3469_v15  ;;  %3122 = vmatprep.subr.bf16.mxu1 %v3498_v16 }
 0x5aa   :  { %1543 = vmatpush1.bf16.msra.mxu0 %v3467_v17  ;;  %3123 = vmatpush3.bf16.msra.mxu1 %v3499_v18  ;;  %v3525_v18 = vld [vmem:[#allocation7 + $0x180] ss:$12 sps:$4 sm:$0xff]  }
 0x5ab   :  { %1544 = vmatprep.subr.bf16.mxu0 %v3472_v19  ;;  %3124 = vmatprep.subr.bf16.mxu1 %v3503_v20  ;;  %v3528_v19 = vld [vmem:[#allocation7 + $0x188] ss:$12 sps:$4 sm:$0xff]  }
 0x5ae   :  { %1545 = vmatpush1.bf16.msra.mxu0 %v3470_v21  ;;  %3125 = vmatpush3.bf16.msra.mxu1 %v3504_v22  ;;  %v3531_v21 = vld [vmem:[#allocation7 + $0x19c] ss:$12 sps:$4 sm:$0xff]   ;;  %v3529_v22 = vld [vmem:[#allocation7 + $0x198] ss:$12 sps:$4 sm:$0xff]  }
 0x5af   :  { %1546 = vmatprep.subr.bf16.mxu0 %v3475_v23  ;;  %3126 = vmatprep.subr.bf16.mxu1 %v3508_v24  ;;  %v3532_v23 = vld [vmem:[#allocation7 + $0x1a0] ss:$12 sps:$4 sm:$0xff]  }
 0x5b0   :  { %v3535_v24 = vld [vmem:[#allocation7 + $0x1b4] ss:$12 sps:$4 sm:$0xff]  }
 0x5b2   :  { %1547 = vmatpush1.bf16.msra.mxu0 %v3473_v25  ;;  %3127 = vmatpush3.bf16.msra.mxu1 %v3509_v26  ;;  %v3533_v25 = vld [vmem:[#allocation7 + $0x1b0] ss:$12 sps:$4 sm:$0xff]   ;;  %v3536_v26 = vld [vmem:[#allocation7 + $0x1b8] ss:$12 sps:$4 sm:$0xff]  }
 0x5b3   :  { %1548 = vmatprep.subr.bf16.mxu0 %v3478_v27  ;;  %3128 = vmatprep.subr.bf16.mxu1 %v3513_v28  ;;  %v3539_v27 = vld [vmem:[#allocation7 + $0x1cc] ss:$12 sps:$4 sm:$0xff]   ;;  %v3537_v28 = vld [vmem:[#allocation7 + $0x1c8] ss:$12 sps:$4 sm:$0xff]  }
 0x5b6   :  { %1549 = vmatpush1.bf16.msra.mxu0 %v3476_v29  ;;  %3129 = vmatpush3.bf16.msra.mxu1 %v3514_v30  ;;  %v3540_v29 = vld [vmem:[#allocation7 + $0x1d0] ss:$12 sps:$4 sm:$0xff]  }
 0x5b7   :  { %1550 = vmatprep.subr.bf16.mxu0 %v3481_v31  ;;  %3130 = vmatprep.subr.bf16.mxu1 %v3518_v48  ;;  %v3543_v30 = vld [vmem:[#allocation7 + $0x1e4] ss:$12 sps:$4 sm:$0xff]   ;;  %v3541_v31 = vld [vmem:[#allocation7 + $0x1e0] ss:$12 sps:$4 sm:$0xff]  }
 0x5ba   :  { %1551 = vmatpush1.bf16.msra.mxu0 %v3479_v32  ;;  %3131 = vmatpush3.bf16.msra.mxu1 %v3519_v50  ;;  %v3544_v32 = vld [vmem:[#allocation7 + $0x1e8] ss:$12 sps:$4 sm:$0xff]  }
 0x5bb   :  { %1552 = vmatprep.subr.bf16.mxu0 %v3484_v33  ;;  %3132 = vmatprep.subr.bf16.mxu1 %v3523_v52  ;;  %v3547_v33 = vld [vmem:[#allocation7 + $0x1fc] ss:$12 sps:$4 sm:$0xff]   ;;  %v3560_v52 = vld [vmem:[#allocation7 + $0x258] ss:$12 sps:$4 sm:$0xff]  }
 0x5be   :  { %1553 = vmatpush1.bf16.msra.mxu0 %v3482_v34  ;;  %3133 = vmatpush3.bf16.msra.mxu1 %v3524_v54  ;;  %v4194_v34 = vsub.s32 2, %v806_v57  ;;  %v3563_v54 = vld [vmem:[#allocation7 + $0x270] ss:$12 sps:$4 sm:$0xff]  }
 0x5bf   :  { %1554 = vmatprep.subr.bf16.mxu0 %v3487_v35  ;;  %3308 = vmatprep.subr.bf16.mxu1 %v3877_v0  ;;  %v3545_v35 = vld [vmem:[#allocation7 + $0x1f8] ss:$12 sps:$4 sm:$0xff]  }
 0x5c0   :  { %v3571_v57 = vld [vmem:[#allocation7 + $0x2a4] ss:$12 sps:$4 sm:$0xff]  }
 0x5c2   :  { %1555 = vmatpush1.bf16.msra.mxu0 %v3485_v36  ;;  %v3548_v36 = vld [vmem:[#allocation7 + $0x200] ss:$12 sps:$4 sm:$0xff]  }
 0x5c3   :  { %1556 = vmatprep.subr.bf16.mxu0 %v3492_v37  ;;  %v3551_v37 = vld [vmem:[#allocation7 + $0x214] ss:$12 sps:$4 sm:$0xff]  }
 0x5c6   :  { %1557 = vmatpush1.bf16.msra.mxu0 %v3490_v38  ;;  %v816_v38 = vrot.slane %v4157_v59, %v4194_v34  ;;  %v3569_v59 = vld [vmem:[#allocation7 + $0x2a0] ss:$12 sps:$4 sm:$0xff]  }
 0x5c7   :  { %1558 = vmatprep.subr.bf16.mxu0 %v3497_v39  ;;  %v3549_v39 = vld [vmem:[#allocation7 + $0x210] ss:$12 sps:$4 sm:$0xff]  }
 0x5ca   :  { %1559 = vmatpush1.bf16.msra.mxu0 %v3495_v40  ;;  %v3552_v40 = vld [vmem:[#allocation7 + $0x218] ss:$12 sps:$4 sm:$0xff]  }
 0x5cb   :  { %1560 = vmatprep.subr.bf16.mxu0 %v3502_v41 }
 0x5ce   :  { %1561 = vmatpush1.bf16.msra.mxu0 %v3500_v42  ;;  %v3555_v42 = vld [vmem:[#allocation7 + $0x22c] ss:$12 sps:$4 sm:$0xff]  }
 0x5cf   :  { %1562 = vmatprep.subr.bf16.mxu0 %v3507_v43 }
 0x5d2   :  { %1563 = vmatpush1.bf16.msra.mxu0 %v3505_v44  ;;  %v3553_v44 = vld [vmem:[#allocation7 + $0x228] ss:$12 sps:$4 sm:$0xff]  }
 0x5d3   :  { %1564 = vmatprep.subr.bf16.mxu0 %v3512_v45  ;;  %v3556_v45 = vld [vmem:[#allocation7 + $0x230] ss:$12 sps:$4 sm:$0xff]  }
 0x5d6   :  { %1565 = vmatpush1.bf16.msra.mxu0 %v3510_v46 }
 0x5d7   :  { %1566 = vmatprep.subr.bf16.mxu0 %v3517_v47  ;;  %v3559_v47 = vld [vmem:[#allocation7 + $0x244] ss:$12 sps:$4 sm:$0xff]  }
 0x5da   :  { %1567 = vmatpush1.bf16.msra.mxu0 %v3515_v49  ;;  %v3557_v49 = vld [vmem:[#allocation7 + $0x240] ss:$12 sps:$4 sm:$0xff]  }
 0x5db   :  { %1568 = vmatprep.subr.bf16.mxu0 %v3522_v51  ;;  %v3562_v51 = vld [vmem:[#allocation7 + $0x25c] ss:$12 sps:$4 sm:$0xff]  }
 0x5de   :  { %1569 = vmatpush1.bf16.msra.mxu0 %v3520_v53  ;;  %v3565_v53 = vld [vmem:[#allocation7 + $0x274] ss:$12 sps:$4 sm:$0xff]  }
 0x5df   :  { %1581 = vmatprep.subr.bf16.mxu0 %v3527_v55  ;;  %v3568_v55 = vld [vmem:[#allocation7 + $0x28c] ss:$12 sps:$4 sm:$0xff]  }
 0x674   :  { %v982_v1 = vpop.f32.mrb[8].mxu0  ;;  %v4165_v2 = vpop.f32.mrb[16].mxu1 }
 0x675   :  { %v984_v3 = vpop.f32.mrb[9].mxu0  ;;  %v3306_v4 = vpop.f32.mrb[17].mxu1  ;;  %v4169_v8 = vadd.f32 %v982_v1, %v808_v63  ;;  %v4203_v43 = vadd.f32 %v4165_v2, %v816_v38  ;;  %v3577_v1 = vld [vmem:[#allocation7 + $0x2d4] ss:$12 sps:$4 sm:$0xff]   ;;  %v3575_v2 = vld [vmem:[#allocation7 + $0x2d0] ss:$12 sps:$4 sm:$0xff]  }
 0x676   :  { %v4167_v5 = vadd.f32 %v984_v3, %v812_v62  ;;  %v986_v6 = vpop.f32.mrb[10].mxu0  ;;  %v1028_v7 = vpop.f32.mrb[18].mxu1  ;;  %v3578_v3 = vld [vmem:[#allocation7 + $0x2e8] ss:$12 sps:$4 sm:$0xff]   ;;  %v3580_v4 = vld [vmem:[#allocation7 + $0x2ec] ss:$12 sps:$4 sm:$0xff]  }
 0x677   :  { %v4171_v9 = vadd.f32 %v986_v6, %v808_v63  ;;  %v988_v10 = vpop.f32.mrb[11].mxu0  ;;  %v3307_v11 = vpop.f32.mrb[19].mxu1  ;;  %v1032_v16 = vmax.f32 %v4169_v8, 0.0  ;;  %v4199_v41 = vadd.f32 %v1028_v7, %v816_v38  ;;  %v1034_v48 = vmax.f32 %v4203_v43, 0.0  ;;  %v3572_v63 = vld [vmem:[#allocation7 + $0x2b8] ss:$12 sps:$4 sm:$0xff]  }
 0x678   :  { %v4173_v12 = vadd.f32 %v988_v10, %v812_v62  ;;  %v1033_v14 = vmax.f32 %v4167_v5, 0.0  ;;  %v3574_v62 = vld [vmem:[#allocation7 + $0x2bc] ss:$12 sps:$4 sm:$0xff]   ;;  %v3583_v6 = vld [vmem:[#allocation7 + $0x304] ss:$12 sps:$4 sm:$0xff]  }
 0x679   :  { %v1035_v13 = vmax.f32 %v4171_v9, 0.0  ;;  %v1037_v46 = vmax.f32 %v4199_v41, 0.0  ;;  %v3584_v7 = vld [vmem:[#allocation7 + $0x308] ss:$12 sps:$4 sm:$0xff]   ;;  %v3589_v11 = vld [vmem:[#allocation7 + $0x320] ss:$12 sps:$4 sm:$0xff]  }
 0x67a   :  { %v1036_v15 = vmax.f32 %v4173_v12, 0.0  ;;  %v3585_v10 = vld [vmem:[#allocation7 + $0x248] ss:$12 sps:$4 sm:$0xff]   ;;  %v3704_v43 = vld [vmem:[#allocation9 + $0x110] ss:$8 sps:$4 sm:$0xff]  }
 0x67b   :  { %v1135_v20 = vpack.c.bf16 %v1035_v13, %v1032_v16  ;;  %v1137_v50 = vpack.c.bf16 %v1037_v46, %v1034_v48  ;;  %v3613_v38 = vld [vmem:[#allocation7 + $0x394] ss:$12 sps:$4 sm:$0xff]   ;;  %v3709_v9 = vld [vmem:[#allocation9 + $0x124] ss:$8 sps:$4 sm:$0xff]   ;;  %v3710_v12 = vld [vmem:[#allocation9 + $0x130] ss:$8 sps:$4 sm:$0xff]  }
 0x67c   :  { %v1136_v17 = vpack.c.bf16 %v1036_v15, %v1033_v14  ;;  %v3701_v8 = vld [vmem:[#allocation9 + $0x100] ss:$8 sps:$4 sm:$0xff]   ;;  %v3712_v5 = vld [vmem:[#allocation9 + $0x134] ss:$8 sps:$4 sm:$0xff]  }
 0x67d   :  { %v3718_v41 = vld [vmem:[#allocation9 + $0x154] ss:$8 sps:$4 sm:$0xff]  }
 0x67e   :  { %1570 = vmatprep.mubr.bf16.mxu0 %v1136_v17  ;;  %1656 = vmatprep.mubr.bf16.mxu1 %v1136_v17  ;;  %v3581_v17 = vld [vmem:[#allocation7 + $0x300] ss:$12 sps:$4 sm:$0xff]  }
 0x67f   :  { %1571 = vmatmul.mubr.bf16.vlgmr.msra.gmra.mrb[12].mxu0 %v1135_v20  ;;  %1657 = vmatmul.mubr.bf16.vlgmr.msra.gmra.mrb[20].mxu1 %v1135_v20  ;;  %v3594_v20 = vld [vmem:[#allocation7 + $0x338] ss:$12 sps:$4 sm:$0xff]  }
 0x680   :  { %1582 = vmatpush1.bf16.msra.mxu0 %v3525_v18  ;;  %3309 = vmatpush3.bf16.msra.mxu1 %v3528_v19  ;;  %v3588_v18 = vld [vmem:[#allocation7 + $0x31c] ss:$12 sps:$4 sm:$0xff]   ;;  %v3590_v19 = vld [vmem:[#allocation7 + $0x260] ss:$12 sps:$4 sm:$0xff]  }
 0x681   :  { %1583 = vmatprep.subr.bf16.mxu0 %v3531_v21  ;;  %3310 = vmatprep.subr.bf16.mxu1 %v3877_v0  ;;  %v3586_v21 = vld [vmem:[#allocation7 + $0x318] ss:$12 sps:$4 sm:$0xff]  }
 0x682   :  { %1613 = vmatprep.mubr.bf16.mxu0 %v3879_v61  ;;  %3324 = vmatprep.mubr.msk.bf16.mxu1 %vm3878_vm0, %v3877_v0 }
 0x684   :  { %1584 = vmatpush1.bf16.msra.mxu0 %v3529_v22  ;;  %3311 = vmatpush3.bf16.msra.mxu1 %v3532_v23  ;;  %v3593_v22 = vld [vmem:[#allocation7 + $0x334] ss:$12 sps:$4 sm:$0xff]   ;;  %v3595_v23 = vld [vmem:[#allocation7 + $0x278] ss:$12 sps:$4 sm:$0xff]  }
 0x685   :  { %1585 = vmatprep.subr.bf16.mxu0 %v3535_v24  ;;  %3312 = vmatprep.subr.bf16.mxu1 %v3877_v0  ;;  %v3599_v24 = vld [vmem:[#allocation7 + $0x350] ss:$12 sps:$4 sm:$0xff]  }
 0x688   :  { %1586 = vmatpush1.bf16.msra.mxu0 %v3533_v25  ;;  %3313 = vmatpush3.bf16.msra.mxu1 %v3536_v26  ;;  %v3591_v25 = vld [vmem:[#allocation7 + $0x330] ss:$12 sps:$4 sm:$0xff]   ;;  %v3598_v26 = vld [vmem:[#allocation7 + $0x34c] ss:$12 sps:$4 sm:$0xff]  }
 0x689   :  { %1587 = vmatprep.subr.bf16.mxu0 %v3539_v27  ;;  %3314 = vmatprep.subr.bf16.mxu1 %v3877_v0  ;;  %v3600_v27 = vld [vmem:[#allocation7 + $0x290] ss:$12 sps:$4 sm:$0xff]  }
 0x68c   :  { %1588 = vmatpush1.bf16.msra.mxu0 %v3537_v28  ;;  %3315 = vmatpush3.bf16.msra.mxu1 %v3540_v29  ;;  %v3604_v28 = vld [vmem:[#allocation7 + $0x368] ss:$12 sps:$4 sm:$0xff]  }
 0x68d   :  { %1589 = vmatprep.subr.bf16.mxu0 %v3543_v30  ;;  %3316 = vmatprep.subr.bf16.mxu1 %v3877_v0  ;;  %v3596_v29 = vld [vmem:[#allocation7 + $0x348] ss:$12 sps:$4 sm:$0xff]   ;;  %v3603_v30 = vld [vmem:[#allocation7 + $0x364] ss:$12 sps:$4 sm:$0xff]  }
 0x690   :  { %1590 = vmatpush1.bf16.msra.mxu0 %v3541_v31  ;;  %3317 = vmatpush3.bf16.msra.mxu1 %v3544_v32  ;;  %v3605_v31 = vld [vmem:[#allocation7 + $0x2a8] ss:$12 sps:$4 sm:$0xff]   ;;  %v3609_v32 = vld [vmem:[#allocation7 + $0x380] ss:$12 sps:$4 sm:$0xff]  }
 0x691   :  { %1591 = vmatprep.subr.bf16.mxu0 %v3547_v33  ;;  %3318 = vmatprep.subr.bf16.mxu1 %v3877_v0  ;;  %v3601_v33 = vld [vmem:[#allocation7 + $0x360] ss:$12 sps:$4 sm:$0xff]  }
 0x694   :  { %1592 = vmatpush1.bf16.msra.mxu0 %v3545_v35  ;;  %3319 = vmatpush3.bf16.msra.mxu1 %v3548_v36  ;;  %v3608_v35 = vld [vmem:[#allocation7 + $0x37c] ss:$12 sps:$4 sm:$0xff]   ;;  %v3610_v36 = vld [vmem:[#allocation7 + $0x2c0] ss:$12 sps:$4 sm:$0xff]  }
 0x695   :  { %1593 = vmatprep.subr.bf16.mxu0 %v3551_v37  ;;  %3320 = vmatprep.subr.bf16.mxu1 %v3877_v0  ;;  %v3606_v37 = vld [vmem:[#allocation7 + $0x378] ss:$12 sps:$4 sm:$0xff]  }
 0x698   :  { %1594 = vmatpush1.bf16.msra.mxu0 %v3549_v39  ;;  %3321 = vmatpush3.bf16.msra.mxu1 %v3552_v40  ;;  %v3614_v39 = vld [vmem:[#allocation7 + $0x398] ss:$12 sps:$4 sm:$0xff]   ;;  %v3611_v40 = vld [vmem:[#allocation7 + $0x390] ss:$12 sps:$4 sm:$0xff]  }
 0x699   :  { %1595 = vmatprep.subr.bf16.mxu0 %v3555_v42  ;;  %3322 = vmatprep.subr.bf16.mxu1 %v3877_v0  ;;  %v3615_v42 = vld [vmem:[#allocation7 + $0x2d8] ss:$12 sps:$4 sm:$0xff]  }
 0x69c   :  { %1596 = vmatpush1.bf16.msra.mxu0 %v3553_v44  ;;  %3323 = vmatpush3.bf16.msra.mxu1 %v3556_v45  ;;  %v3618_v44 = vld [vmem:[#allocation7 + $0x3ac] ss:$12 sps:$4 sm:$0xff]   ;;  %v3619_v45 = vld [vmem:[#allocation7 + $0x3b0] ss:$12 sps:$4 sm:$0xff]  }
 0x69d   :  { %2214 = vmatprep.subr.bf16.mxu1 %v3559_v47  ;;  %3149 = vmatprep.subr.bf16.mxu0 %v3584_v7  ;;  %v3616_v47 = vld [vmem:[#allocation7 + $0x3a8] ss:$12 sps:$4 sm:$0xff]  }
 0x69f   :  { %1614 = vmatmul.mubr.bf16.vlgmr.msra.gmra.mrb[12].mxu0 %v1137_v50  ;;  %3325 = vmatmul.mubr.bf16.vlgmr.msra.gmra.mrb[24].mxu1 %v1137_v50  ;;  %v3623_v50 = vld [vmem:[#allocation7 + $0x3c4] ss:$12 sps:$4 sm:$0xff]  }
 0x6a0   :  { %2215 = vmatpush1.bf16.msra.mxu1 %v3557_v49  ;;  %3150 = vmatpush3.bf16.msra.mxu0 %v3585_v10  ;;  %v3620_v49 = vld [vmem:[#allocation7 + $0x2f0] ss:$12 sps:$4 sm:$0xff]  }
 0x6a1   :  { %2216 = vmatprep.subr.bf16.mxu1 %v3562_v51  ;;  %3151 = vmatprep.subr.bf16.mxu0 %v3589_v11 }
 0x6a4   :  { %2217 = vmatpush1.bf16.msra.mxu1 %v3560_v52  ;;  %3152 = vmatpush3.bf16.msra.mxu0 %v3590_v19 }
 0x6a5   :  { %2218 = vmatprep.subr.bf16.mxu1 %v3565_v53  ;;  %3153 = vmatprep.subr.bf16.mxu0 %v3594_v20 }
 0x6a8   :  { %2219 = vmatpush1.bf16.msra.mxu1 %v3563_v54  ;;  %3154 = vmatpush3.bf16.msra.mxu0 %v3595_v23 }
 0x6a9   :  { %2220 = vmatprep.subr.bf16.mxu1 %v3568_v55  ;;  %3155 = vmatprep.subr.bf16.mxu0 %v3599_v24 }
 0x6ac   :  { %2221 = vmatpush1.bf16.msra.mxu1 %v3566_v56  ;;  %3156 = vmatpush3.bf16.msra.mxu0 %v3600_v27 }
 0x6ad   :  { %2222 = vmatprep.subr.bf16.mxu1 %v3571_v57  ;;  %3157 = vmatprep.subr.bf16.mxu0 %v3604_v28  ;;  %v1134_v57 = vld [vmem:[%s4276_s10] ss:$2 sm:$0x7] }
 0x6b0   :  { %2223 = vmatpush1.bf16.msra.mxu1 %v3569_v59  ;;  %3158 = vmatpush3.bf16.msra.mxu0 %v3605_v31  ;;  %v1150_v59 = vrot.slane %v1134_v57, %v4194_v34 }
 0x6b1   :  { %2224 = vmatprep.subr.bf16.mxu1 %v3574_v62  ;;  %3159 = vmatprep.subr.bf16.mxu0 %v3609_v32  ;;  %v1142_v62 = vrot.slane %v1134_v57, %v4159_v60 }
 0x6b4   :  { %2225 = vmatpush1.bf16.msra.mxu1 %v3572_v63  ;;  %3160 = vmatpush3.bf16.msra.mxu0 %v3610_v36  ;;  %v1146_v63 = vrot.slane %v1134_v57, %v4152_v58  ;;  %v3624_v36 = vld [vmem:[#allocation7 + $0x3c8] ss:$12 sps:$4 sm:$0xff]   ;;  %v3645_v57 = vld [vmem:[#allocation7 + $0x450] ss:$12 sps:$4 sm:$0xff]  }
 0x6b5   :  { %2226 = vmatprep.subr.bf16.mxu1 %v3577_v1  ;;  %3161 = vmatprep.subr.bf16.mxu0 %v3614_v39  ;;  %v3628_v39 = vld [vmem:[#allocation7 + $0x3e0] ss:$12 sps:$4 sm:$0xff]  }
 0x6b8   :  { %2227 = vmatpush1.bf16.msra.mxu1 %v3575_v2  ;;  %3162 = vmatpush3.bf16.msra.mxu0 %v3615_v42  ;;  %v3629_v42 = vld [vmem:[#allocation7 + $0x3f0] ss:$12 sps:$4 sm:$0xff]  }
 0x6b9   :  { %2228 = vmatprep.subr.bf16.mxu1 %v3580_v4  ;;  %3163 = vmatprep.subr.bf16.mxu0 %v3619_v45  ;;  %v3635_v45 = vld [vmem:[#allocation7 + $0x40c] ss:$12 sps:$4 sm:$0xff]  }
 0x6bc   :  { %2229 = vmatpush1.bf16.msra.mxu1 %v3578_v3  ;;  %3164 = vmatpush3.bf16.msra.mxu0 %v3620_v49  ;;  %v3636_v49 = vld [vmem:[#allocation7 + $0x410] ss:$12 sps:$4 sm:$0xff]  }
 0x6bd   :  { %2230 = vmatprep.subr.bf16.mxu1 %v3583_v6  ;;  %3328 = vmatprep.subr.bf16.mxu0 %v3877_v0 }
 0x6c0   :  { %2231 = vmatpush1.bf16.msra.mxu1 %v3581_v17 }
 0x6c1   :  { %2232 = vmatprep.subr.bf16.mxu1 %v3588_v18 }
 0x6c4   :  { %2233 = vmatpush1.bf16.msra.mxu1 %v3586_v21 }
 0x6c5   :  { %2234 = vmatprep.subr.bf16.mxu1 %v3593_v22 }
 0x6c8   :  { %2235 = vmatpush1.bf16.msra.mxu1 %v3591_v25 }
 0x6c9   :  { %2236 = vmatprep.subr.bf16.mxu1 %v3598_v26 }
 0x6cc   :  { %2237 = vmatpush1.bf16.msra.mxu1 %v3596_v29 }
 0x6cd   :  { %2238 = vmatprep.subr.bf16.mxu1 %v3603_v30 }
 0x6d0   :  { %2239 = vmatpush1.bf16.msra.mxu1 %v3601_v33 }
 0x6d1   :  { %2240 = vmatprep.subr.bf16.mxu1 %v3608_v35  ;;  %v3621_v35 = vld [vmem:[#allocation7 + $0x3c0] ss:$12 sps:$4 sm:$0xff]  }
 0x6d4   :  { %2241 = vmatpush1.bf16.msra.mxu1 %v3606_v37  ;;  %v3627_v37 = vld [vmem:[#allocation7 + $0x3dc] ss:$12 sps:$4 sm:$0xff]  }
 0x6d5   :  { %2242 = vmatprep.subr.bf16.mxu1 %v3613_v38  ;;  %v3625_v38 = vld [vmem:[#allocation7 + $0x3d8] ss:$12 sps:$4 sm:$0xff]  }
 0x6d8   :  { %2243 = vmatpush1.bf16.msra.mxu1 %v3611_v40  ;;  %v3631_v40 = vld [vmem:[#allocation7 + $0x3f4] ss:$12 sps:$4 sm:$0xff]  }
 0x6d9   :  { %2244 = vmatprep.subr.bf16.mxu1 %v3618_v44  ;;  %v3632_v44 = vld [vmem:[#allocation7 + $0x3f8] ss:$12 sps:$4 sm:$0xff]  }
 0x6dc   :  { %2245 = vmatpush1.bf16.msra.mxu1 %v3616_v47  ;;  %v3633_v47 = vld [vmem:[#allocation7 + $0x408] ss:$12 sps:$4 sm:$0xff]  }
 0x6dd   :  { %2257 = vmatprep.subr.bf16.mxu1 %v3623_v50  ;;  %v3639_v50 = vld [vmem:[#allocation7 + $0x424] ss:$12 sps:$4 sm:$0xff]  }
 0x752   :  { %v3134_v51 = vpop.f32.mrb[20].mxu1 }
 0x753   :  { %v3135_v52 = vpop.f32.mrb[21].mxu1 }
 0x754   :  { %v3136_v53 = vadd.f32 %v3135_v52, %v3134_v51  ;;  %v3137_v54 = vpop.f32.mrb[22].mxu1  ;;  %v3637_v51 = vld [vmem:[#allocation7 + $0x420] ss:$12 sps:$4 sm:$0xff]   ;;  %v3640_v52 = vld [vmem:[#allocation7 + $0x428] ss:$12 sps:$4 sm:$0xff]  }
 0x755   :  { %v3138_v55 = vpop.f32.mrb[23].mxu1 }
 0x756   :  { %v3139_v56 = vadd.f32 %v3138_v55, %v3137_v54  ;;  %v1659_v1 = vadd.f32 %v3136_v53, %v1150_v59  ;;  %v3643_v53 = vld [vmem:[#allocation7 + $0x43c] ss:$12 sps:$4 sm:$0xff]   ;;  %v3641_v54 = vld [vmem:[#allocation7 + $0x438] ss:$12 sps:$4 sm:$0xff]   ;;  %v3644_v55 = vld [vmem:[#allocation7 + $0x440] ss:$12 sps:$4 sm:$0xff]  }
 0x758   :  { %v1662_v11 = vadd.f32 %v3139_v56, %v1150_v59  ;;  %v3647_v56 = vld [vmem:[#allocation7 + $0x454] ss:$12 sps:$4 sm:$0xff]   ;;  %v3648_v59 = vld [vmem:[#allocation7 + $0x458] ss:$12 sps:$4 sm:$0xff]  }
 0x772   :  { %v1615_v2 = vpop.f32.mrb[12].mxu0  ;;  %v1699_v3 = vpop.f32.mrb[24].mxu1 }
 0x773   :  { %v3348_v4 = vadd.f32 %v1615_v2, %v1142_v62  ;;  %v1700_v6 = vadd.f32 %v1699_v3, %v1659_v1  ;;  %v1617_v7 = vpop.f32.mrb[13].mxu0  ;;  %v3326_v10 = vpop.f32.mrb[25].mxu1  ;;  %v3652_v1 = vld [vmem:[#allocation7 + $0x470] ss:$12 sps:$4 sm:$0xff]   ;;  %v3655_v2 = vld [vmem:[#allocation9 + $0x4] ss:$8 sps:$4 sm:$0xff]  }
 0x774   :  { %v3349_v17 = vadd.f32 %v1617_v7, %v1146_v63  ;;  %v1619_v18 = vpop.f32.mrb[14].mxu0  ;;  %v1702_v19 = vpop.f32.mrb[26].mxu1  ;;  %v3653_v3 = vld [vmem:[#allocation9] ss:$8 sps:$4 sm:$0xff]   ;;  %v3661_v7 = vld [vmem:[#allocation9 + $0x24] ss:$8 sps:$4 sm:$0xff]  }
 0x775   :  { %v3350_v20 = vadd.f32 %v1619_v18, %v1142_v62  ;;  %v1703_v21 = vadd.f32 %v1702_v19, %v1662_v11  ;;  %v1621_v22 = vpop.f32.mrb[15].mxu0  ;;  %v3327_v23 = vpop.f32.mrb[27].mxu1  ;;  %v1706_v25 = vmax.f32 %v3348_v4, 0.0  ;;  %v1708_v26 = vmax.f32 %v1700_v6, 0.0  ;;  %v3651_v62 = vld [vmem:[#allocation7 + $0x46c] ss:$12 sps:$4 sm:$0xff]  }
 0x776   :  { %v3351_v24 = vadd.f32 %v1621_v22, %v1146_v63  ;;  %v1707_v29 = vmax.f32 %v3349_v17, 0.0  ;;  %v3649_v63 = vld [vmem:[#allocation7 + $0x468] ss:$12 sps:$4 sm:$0xff]   ;;  %v3656_v6 = vld [vmem:[#allocation9 + $0x10] ss:$8 sps:$4 sm:$0xff]  }
 0x777   :  { %v1709_v27 = vmax.f32 %v3350_v20, 0.0  ;;  %v1711_v28 = vmax.f32 %v1703_v21, 0.0  ;;  %v3658_v4 = vld [vmem:[#allocation9 + $0x14] ss:$8 sps:$4 sm:$0xff]   ;;  %v3659_v10 = vld [vmem:[#allocation9 + $0x20] ss:$8 sps:$4 sm:$0xff]  }
 0x778   :  { %v1710_v30 = vmax.f32 %v3351_v24, 0.0  ;;  %v3664_v11 = vld [vmem:[#allocation9 + $0x34] ss:$8 sps:$4 sm:$0xff]   ;;  %v3667_v17 = vld [vmem:[#allocation9 + $0x44] ss:$8 sps:$4 sm:$0xff]  }
 0x779   :  { %v1811_v31 = vpack.c.bf16 %v1709_v27, %v1706_v25  ;;  %v4219_v32 = vpack.c.bf16 %v1711_v28, %v1708_v26  ;;  %v3665_v18 = vld [vmem:[#allocation9 + $0x40] ss:$8 sps:$4 sm:$0xff]   ;;  %v3670_v19 = vld [vmem:[#allocation9 + $0x54] ss:$8 sps:$4 sm:$0xff]   ;;  %v3668_v20 = vld [vmem:[#allocation9 + $0x50] ss:$8 sps:$4 sm:$0xff]  }
 0x77a   :  { %v1812_v33 = vpack.c.bf16 %v1710_v30, %v1707_v29  ;;  %v3673_v21 = vld [vmem:[#allocation9 + $0x64] ss:$8 sps:$4 sm:$0xff]   ;;  %v3671_v22 = vld [vmem:[#allocation9 + $0x60] ss:$8 sps:$4 sm:$0xff]   ;;  %v3676_v23 = vld [vmem:[#allocation9 + $0x74] ss:$8 sps:$4 sm:$0xff]  }
 0x77b   :  { %v3674_v24 = vld [vmem:[#allocation9 + $0x70] ss:$8 sps:$4 sm:$0xff]   ;;  %v3679_v25 = vld [vmem:[#allocation9 + $0x84] ss:$8 sps:$4 sm:$0xff]   ;;  %v3677_v26 = vld [vmem:[#allocation9 + $0x80] ss:$8 sps:$4 sm:$0xff]  }
 0x77c   :  { %2246 = vmatprep.mubr.bf16.mxu1 %v1812_v33  ;;  %2332 = vmatprep.mubr.bf16.mxu0 %v1812_v33  ;;  %v3682_v27 = vld [vmem:[#allocation9 + $0x94] ss:$8 sps:$4 sm:$0xff]   ;;  %v3680_v28 = vld [vmem:[#allocation9 + $0x90] ss:$8 sps:$4 sm:$0xff]   ;;  %v3685_v29 = vld [vmem:[#allocation9 + $0xa4] ss:$8 sps:$4 sm:$0xff]  }
 0x77d   :  { %2247 = vmatmul.mubr.bf16.vlgmr.msra.gmra.mrb[28].mxu1 %v1811_v31  ;;  %2333 = vmatmul.mubr.bf16.vlgmr.msra.gmra.mrb[16].mxu0 %v1811_v31  ;;  %v3683_v30 = vld [vmem:[#allocation9 + $0xa0] ss:$8 sps:$4 sm:$0xff]   ;;  %v3688_v31 = vld [vmem:[#allocation9 + $0xb4] ss:$8 sps:$4 sm:$0xff]   ;;  %v3691_v33 = vld [vmem:[#allocation9 + $0xc4] ss:$8 sps:$4 sm:$0xff]  }
 0x77e   :  { %2258 = vmatpush1.bf16.msra.mxu1 %v3621_v35  ;;  %3329 = vmatpush3.bf16.msra.mxu0 %v3624_v36  ;;  %v3689_v35 = vld [vmem:[#allocation9 + $0xc0] ss:$8 sps:$4 sm:$0xff]   ;;  %v3694_v36 = vld [vmem:[#allocation9 + $0xd4] ss:$8 sps:$4 sm:$0xff]  }
 0x77f   :  { %2259 = vmatprep.subr.bf16.mxu1 %v3627_v37  ;;  %3330 = vmatprep.subr.bf16.mxu0 %v3877_v0  ;;  %v3692_v37 = vld [vmem:[#allocation9 + $0xd0] ss:$8 sps:$4 sm:$0xff]  }
 0x780   :  { %2289 = vmatprep.mubr.bf16.mxu1 %v3879_v61  ;;  %3344 = vmatprep.mubr.msk.bf16.mxu0 %vm3878_vm0, %v3877_v0 }
 0x782   :  { %2260 = vmatpush1.bf16.msra.mxu1 %v3625_v38  ;;  %3331 = vmatpush3.bf16.msra.mxu0 %v3628_v39  ;;  %v3697_v38 = vld [vmem:[#allocation9 + $0xe4] ss:$8 sps:$4 sm:$0xff]   ;;  %v3695_v39 = vld [vmem:[#allocation9 + $0xe0] ss:$8 sps:$4 sm:$0xff]  }
 0x783   :  { %2261 = vmatprep.subr.bf16.mxu1 %v3631_v40  ;;  %3332 = vmatprep.subr.bf16.mxu0 %v3877_v0  ;;  %v3700_v40 = vld [vmem:[#allocation9 + $0xf4] ss:$8 sps:$4 sm:$0xff]  }
 0x786   :  { %2262 = vmatpush1.bf16.msra.mxu1 %v3629_v42  ;;  %3333 = vmatpush3.bf16.msra.mxu0 %v3632_v44  ;;  %v3698_v42 = vld [vmem:[#allocation9 + $0xf0] ss:$8 sps:$4 sm:$0xff]   ;;  %v3703_v44 = vld [vmem:[#allocation9 + $0x104] ss:$8 sps:$4 sm:$0xff]  }
 0x787   :  { %2263 = vmatprep.subr.bf16.mxu1 %v3635_v45  ;;  %3334 = vmatprep.subr.bf16.mxu0 %v3877_v0 }
 0x78a   :  { %2264 = vmatpush1.bf16.msra.mxu1 %v3633_v47  ;;  %3335 = vmatpush3.bf16.msra.mxu0 %v3636_v49 }
 0x78b   :  { %2265 = vmatprep.subr.bf16.mxu1 %v3639_v50  ;;  %3336 = vmatprep.subr.bf16.mxu0 %v3877_v0 }
 0x78e   :  { %2266 = vmatpush1.bf16.msra.mxu1 %v3637_v51  ;;  %3337 = vmatpush3.bf16.msra.mxu0 %v3640_v52 }
 0x78f   :  { %2267 = vmatprep.subr.bf16.mxu1 %v3643_v53  ;;  %3338 = vmatprep.subr.bf16.mxu0 %v3877_v0  ;;  %v2940_v53 = vld [vmem:[%s4276_s10 + $0x1] ss:$2 sm:$0x7] }
 0x792   :  { %2268 = vmatpush1.bf16.msra.mxu1 %v3641_v54  ;;  %3339 = vmatpush3.bf16.msra.mxu0 %v3644_v55  ;;  %v1826_v54 = vrot.slane %v2940_v53, %v4194_v34  ;;  %v1818_v55 = vrot.slane %v2940_v53, %v4159_v60 }
 0x793   :  { %2269 = vmatprep.subr.bf16.mxu1 %v3647_v56  ;;  %3340 = vmatprep.subr.bf16.mxu0 %v3877_v0  ;;  %v1822_v56 = vrot.slane %v2940_v53, %v4152_v58 }
 0x796   :  { %2270 = vmatpush1.bf16.msra.mxu1 %v3645_v57  ;;  %3341 = vmatpush3.bf16.msra.mxu0 %v3648_v59 }
 0x797   :  { %2271 = vmatprep.subr.bf16.mxu1 %v3651_v62  ;;  %3342 = vmatprep.subr.bf16.mxu0 %v3877_v0  ;;  %v3662_v0 = vld [vmem:[#allocation9 + $0x30] ss:$8 sps:$4 sm:$0xff]  }
 0x79a   :  { %2272 = vmatpush1.bf16.msra.mxu1 %v3649_v63  ;;  %3343 = vmatpush3.bf16.msra.mxu0 %v3652_v1 }
 0x79b   :  { %2697 = vmatprep.subr.bf16.mxu0 %v3655_v2 }
 0x79d   :  { %2290 = vmatmul.mubr.bf16.vlgmr.msra.gmra.mrb[28].mxu1 %v4219_v32  ;;  %3345 = vmatmul.mubr.bf16.vlgmr.msra.gmra.mrb[20].mxu0 %v4219_v32  ;;  %v3686_v32 = vld [vmem:[#allocation9 + $0xb0] ss:$8 sps:$4 sm:$0xff]  }
 0x79e   :  { %2698 = vmatpush1.bf16.msra.mxu0 %v3653_v3 }
 0x79f   :  { %2699 = vmatprep.subr.bf16.mxu0 %v3658_v4 }
 0x7a2   :  { %2700 = vmatpush1.bf16.msra.mxu0 %v3656_v6 }
 0x7a3   :  { %2701 = vmatprep.subr.bf16.mxu0 %v3661_v7 }
 0x7a6   :  { %2702 = vmatpush1.bf16.msra.mxu0 %v3659_v10 }
 0x7a7   :  { %2703 = vmatprep.subr.bf16.mxu0 %v3664_v11 }
 0x7aa   :  { %2704 = vmatpush1.bf16.msra.mxu0 %v3662_v0 }
 0x7ab   :  { %2705 = vmatprep.subr.bf16.mxu0 %v3667_v17 }
 0x7ae   :  { %2706 = vmatpush1.bf16.msra.mxu0 %v3665_v18 }
 0x7af   :  { %2707 = vmatprep.subr.bf16.mxu0 %v3670_v19 }
 0x7b2   :  { %2708 = vmatpush1.bf16.msra.mxu0 %v3668_v20 }
 0x7b3   :  { %2709 = vmatprep.subr.bf16.mxu0 %v3673_v21 }
 0x7b6   :  { %2710 = vmatpush1.bf16.msra.mxu0 %v3671_v22 }
 0x7b7   :  { %2711 = vmatprep.subr.bf16.mxu0 %v3676_v23 }
 0x7ba   :  { %2712 = vmatpush1.bf16.msra.mxu0 %v3674_v24 }
 0x7bb   :  { %2713 = vmatprep.subr.bf16.mxu0 %v3679_v25 }
 0x7be   :  { %2714 = vmatpush1.bf16.msra.mxu0 %v3677_v26 }
 0x7bf   :  { %2715 = vmatprep.subr.bf16.mxu0 %v3682_v27 }
 0x7c2   :  { %2716 = vmatpush1.bf16.msra.mxu0 %v3680_v28 }
 0x7c3   :  { %2717 = vmatprep.subr.bf16.mxu0 %v3685_v29 }
 0x7c6   :  { %2718 = vmatpush1.bf16.msra.mxu0 %v3683_v30 }
 0x7c7   :  { %2719 = vmatprep.subr.bf16.mxu0 %v3688_v31 }
 0x7ca   :  { %2720 = vmatpush1.bf16.msra.mxu0 %v3686_v32 }
 0x7cb   :  { %2721 = vmatprep.subr.bf16.mxu0 %v3691_v33 }
 0x7ce   :  { %2722 = vmatpush1.bf16.msra.mxu0 %v3689_v35  ;;  %v3724_v35 = vld [vmem:[#allocation9 + $0x174] ss:$8 sps:$4 sm:$0xff]  }
 0x7cf   :  { %2723 = vmatprep.subr.bf16.mxu0 %v3694_v36  ;;  %v3722_v36 = vld [vmem:[#allocation9 + $0x170] ss:$8 sps:$4 sm:$0xff]  }
 0x7d2   :  { %2724 = vmatpush1.bf16.msra.mxu0 %v3692_v37  ;;  %v2442_v37 = vld [vmem:[#allocation10] sm:$0x3] }
 0x7d3   :  { %2725 = vmatprep.subr.bf16.mxu0 %v3697_v38  ;;  %v2450_v38 = vrot.slane %v2442_v37, %v4159_v60 }
 0x7d6   :  { %2726 = vmatpush1.bf16.msra.mxu0 %v3695_v39  ;;  %v2454_v39 = vrot.slane %v2442_v37, %v4152_v58 }
 0x7d7   :  { %2727 = vmatprep.subr.bf16.mxu0 %v3700_v40 }
 0x7da   :  { %2728 = vmatpush1.bf16.msra.mxu0 %v3698_v42 }
 0x7db   :  { %2740 = vmatprep.subr.bf16.mxu0 %v3703_v44 }
 0x850   :  { %v3165_v45 = vpop.f32.mrb[16].mxu0 }
 0x851   :  { %v3166_v47 = vpop.f32.mrb[17].mxu0 }
 0x852   :  { %v3167_v49 = vadd.f32 %v3166_v47, %v3165_v45  ;;  %v3168_v50 = vpop.f32.mrb[18].mxu0 }
 0x853   :  { %v3169_v51 = vpop.f32.mrb[19].mxu0 }
 0x854   :  { %v3170_v52 = vadd.f32 %v3169_v51, %v3168_v50  ;;  %v2335_v57 = vadd.f32 %v3167_v49, %v1826_v54 }
 0x856   :  { %v2338_v4 = vadd.f32 %v3170_v52, %v1826_v54 }
 0x870   :  { %v2291_v59 = vpop.f32.mrb[28].mxu1  ;;  %v2375_v62 = vpop.f32.mrb[20].mxu0 }
 0x871   :  { %v3352_v63 = vadd.f32 %v2291_v59, %v1818_v55  ;;  %v2376_v1 = vadd.f32 %v2375_v62, %v2335_v57  ;;  %v2293_v2 = vpop.f32.mrb[29].mxu1  ;;  %v3346_v3 = vpop.f32.mrb[21].mxu0 }
 0x872   :  { %v3353_v6 = vadd.f32 %v2293_v2, %v1822_v56  ;;  %v2295_v7 = vpop.f32.mrb[30].mxu1  ;;  %v2378_v10 = vpop.f32.mrb[22].mxu0 }
 0x873   :  { %v2382_v11 = vmax.f32 %v3352_v63, 0.0  ;;  %v2384_v0 = vmax.f32 %v2376_v1, 0.0  ;;  %v3354_v17 = vadd.f32 %v2295_v7, %v1818_v55  ;;  %v2379_v18 = vadd.f32 %v2378_v10, %v2338_v4  ;;  %v2297_v34 = vpop.f32.mrb[31].mxu1  ;;  %v3347_v19 = vpop.f32.mrb[23].mxu0 }
 0x874   :  { %v2383_v20 = vmax.f32 %v3353_v6, 0.0  ;;  %v3355_v21 = vadd.f32 %v2297_v34, %v1822_v56 }
 0x875   :  { %v2385_v22 = vmax.f32 %v3354_v17, 0.0  ;;  %v2387_v23 = vmax.f32 %v2379_v18, 0.0  ;;  %v2388_v25 = vadd.f32 %v2382_v11, %v1032_v16  ;;  %v2390_v26 = vadd.f32 %v2384_v0, %v1034_v48  ;;  %v3706_v16 = vld [vmem:[#allocation9 + $0x114] ss:$8 sps:$4 sm:$0xff]   ;;  %v3721_v48 = vld [vmem:[#allocation9 + $0x164] ss:$8 sps:$4 sm:$0xff]  }
 0x876   :  { %v2386_v24 = vmax.f32 %v3355_v21, 0.0  ;;  %v2389_v29 = vadd.f32 %v2383_v20, %v1033_v14  ;;  %v3715_v14 = vld [vmem:[#allocation9 + $0x144] ss:$8 sps:$4 sm:$0xff]  }
 0x877   :  { %v2391_v27 = vadd.f32 %v2385_v22, %v1035_v13  ;;  %v2393_v28 = vadd.f32 %v2387_v23, %v1037_v46  ;;  %v3707_v13 = vld [vmem:[#allocation9 + $0x120] ss:$8 sps:$4 sm:$0xff]   ;;  %v3716_v46 = vld [vmem:[#allocation9 + $0x150] ss:$8 sps:$4 sm:$0xff]  }
 0x878   :  { %v2392_v30 = vadd.f32 %v2386_v24, %v1036_v15  ;;  %v3713_v15 = vld [vmem:[#allocation9 + $0x140] ss:$8 sps:$4 sm:$0xff]  }
 0x879   :  { %v2443_v31 = vpack.c.bf16 %v2391_v27, %v2388_v25  ;;  %v2445_v32 = vpack.c.bf16 %v2393_v28, %v2390_v26 }
 0x87a   :  { %v2444_v33 = vpack.c.bf16 %v2392_v30, %v2389_v29 }
 0x87c   :  { %2729 = vmatprep.mubr.bf16.mxu0 %v2444_v33 }
 0x87d   :  { %2730 = vmatmul.mubr.bf16.vlgmr.msra.gmra.mrb[24].mxu0 %v2443_v31 }
 0x87e   :  { %2741 = vmatpush1.bf16.msra.mxu0 %v3701_v8  ;;  %2772 = vmatprep.mubr.bf16.mxu0 %v3879_v61  ;;  %v3719_v61 = vld [vmem:[#allocation9 + $0x160] ss:$8 sps:$4 sm:$0xff]  }
 0x87f   :  { %2742 = vmatprep.subr.bf16.mxu0 %v3706_v16 }
 0x882   :  { %2743 = vmatpush1.bf16.msra.mxu0 %v3704_v43 }
 0x883   :  { %2744 = vmatprep.subr.bf16.mxu0 %v3709_v9 }
 0x886   :  { %2745 = vmatpush1.bf16.msra.mxu0 %v3707_v13 }
 0x887   :  { %2746 = vmatprep.subr.bf16.mxu0 %v3712_v5 }
 0x88a   :  { %2747 = vmatpush1.bf16.msra.mxu0 %v3710_v12 }
 0x88b   :  { %2748 = vmatprep.subr.bf16.mxu0 %v3715_v14 }
 0x88e   :  { %2749 = vmatpush1.bf16.msra.mxu0 %v3713_v15 }
 0x88f   :  { %2750 = vmatprep.subr.bf16.mxu0 %v3718_v41 }
 0x892   :  { %2751 = vmatpush1.bf16.msra.mxu0 %v3716_v46 }
 0x893   :  { %2752 = vmatprep.subr.bf16.mxu0 %v3721_v48 }
 0x896   :  { %2753 = vmatpush1.bf16.msra.mxu0 %v3719_v61 }
 0x897   :  { %2754 = vmatprep.subr.bf16.mxu0 %v3724_v35 }
 0x89a   :  { %2755 = vmatpush1.bf16.msra.mxu0 %v3722_v36 }
 0x89d   :  { %2773 = vmatmul.mubr.bf16.vlgmr.msra.gmra.mrb[24].mxu0 %v2445_v32 }
 0x970   :  { %v2774_v40 = vpop.f32.mrb[24].mxu0 }
 0x971   :  { %v3356_v42 = vadd.f32 %v2774_v40, %v2450_v38  ;;  %v2776_v44 = vpop.f32.mrb[25].mxu0 }
 0x972   :  { %v3357_v45 = vadd.f32 %v2776_v44, %v2454_v39  ;;  %v2778_v47 = vpop.f32.mrb[26].mxu0 }
 0x973   :  { %2783 = vst [vmem:[%s4279_s13] sm:$0xff] %v3356_v42  ;;  %v3358_v49 = vadd.f32 %v2778_v47, %v2450_v38  ;;  %v2780_v50 = vpop.f32.mrb[27].mxu0 }
 0x974   :  { %2784 = vst [vmem:[%s4279_s13 + $0x8] sm:$0xff] %v3357_v45  ;;  %v3359_v51 = vadd.f32 %v2780_v50, %v2454_v39 }
 0x975   :  { %2785 = vst [vmem:[%s4279_s13 + $0x10] sm:$0xff] %v3358_v49 }
 0x976   :  { %2786 = vst [vmem:[%s4279_s13 + $0x18] sm:$0xff] %v3359_v51 }
 0x977   :  { %2791 = vsyncpa [#allocation3], 1 }
 0x978   :  { %2792 = vsyncpa [#allocation5], 1 }
 0x979   :  { %2793 = vsyncpa [#allocation8], 1 }
 0x97a   :  { %2794 = vsyncpa [#allocation11], 1 }

</bundles_post_ra>
